<compile_context>
chip_gen: v5e
topology: v5e:2x2
jax: 0.10.0
libtpu: 0.0.40
codegen_flags: <defaults>
</compile_context>

<pallas_src>
import jax
import jax.numpy as jnp
import numpy as np
from jax.experimental import pallas as pl
from jax.experimental.pallas import tpu as pltpu

LANE = 128
SUBLANE = 8


def _round_up(x, m):
    return ((x + m - 1) // m) * m


def _make_kernel(n_inputs, compute_dtype):
    def kernel(x_ref, gw_ref, mask_ref, gb_ref,
               w1_ref, b1_ref, w2_ref, b2_ref, o_ref):
        f32 = jnp.float32
        x = x_ref[...].astype(f32)                               # (TB, CIN_PAD)

        # --- gates: VPU multiply + XLU lane-reduce + EUP sigmoid (no MXU) ---
        gate_mult = jnp.zeros_like(x)                            # (TB, CIN_PAD)
        for i in range(n_inputs):
            gw_row = gw_ref[i:i + 1, :].astype(f32)              # (1, CIN_PAD); zero outside segment i
            logit = jnp.sum(x * gw_row, axis=-1, keepdims=True)  # (TB, 1)
            g = jax.nn.sigmoid(logit + gb_ref[0:1, i:i + 1])     # (TB, 1), f32
            gate_mult = gate_mult + g * mask_ref[i:i + 1, :]     # broadcast gate over its lanes
        gated = x * gate_mult                                    # (TB, CIN_PAD)

        # --- fusion MLP: two lane-dense MXU matmuls, f32 accumulation ---
        h = jnp.dot(gated.astype(compute_dtype), w1_ref[...],
                    preferred_element_type=f32) + b1_ref[...]
        h = jnp.maximum(h, 0.0)
        out = jnp.dot(h.astype(compute_dtype), w2_ref[...],
                      preferred_element_type=f32) + b2_ref[...]
        out = jnp.maximum(out, 0.0)
        o_ref[...] = out.astype(o_ref.dtype)

    return kernel


def gated_concat_fusion(xs, gate_ws, gate_bs, w1, b1, w2, b2,
                        *, block_rows=128, compute_dtype=jnp.float32):
    """Batched GatedConcatFusion forward.

    xs:        list of (B, dim_i) arrays (each row is one sample of the module).
    gate_ws:   list of (dim_i, 1) gate weights (Linear(dim_i, 1).weight.T).
    gate_bs:   list of (1,) gate biases.
    w1/b1/w2/b2: fusion-layer parameters stored transposed, (in, out) layout.

    block_rows:    rows per grid step (128 works on all gens; 256 on v6e/v7x).
    compute_dtype: dtype of MXU matmul operands (jnp.bfloat16 recommended on
                   v6e/v7x); gate math, biases and accumulation stay float32.

    Returns (B, output_size).
    """
    # TODO(synk): if the production call really is a single unbatched sample,
    # skip Pallas entirely — the custom-call/DMA overhead exceeds the ~15 KFLOP
    # of work; leave it to XLA fusion in the caller.
    f32 = jnp.float32
    n = len(xs)
    dims = [int(x.shape[-1]) for x in xs]
    sum_dims = sum(dims)
    batch = int(xs[0].shape[0])
    hidden = int(w1.shape[1])
    out_size = int(w2.shape[1])

    cin_pad = _round_up(max(sum_dims, LANE), LANE)
    h_pad = _round_up(max(hidden, LANE), LANE)
    out_pad = _round_up(max(out_size, LANE), LANE)
    n_rows = _round_up(max(n, SUBLANE), SUBLANE)      # sublane-pad gate tables
    gb_lanes = _round_up(max(n, LANE), LANE)

    # ---- host-side layout glue: lane-dense activation slab + padded weights ----
    x_cat = jnp.concatenate([x.astype(f32) for x in xs], axis=-1)   # (B, sum_dims)
    x_cat = jnp.pad(x_cat, ((0, 0), (0, cin_pad - sum_dims)))
    b_pad = _round_up(max(batch, block_rows), block_rows)
    if b_pad != batch:
        x_cat = jnp.pad(x_cat, ((0, b_pad - batch), (0, 0)))

    gw_mat = jnp.zeros((n_rows, cin_pad), f32)        # row i: gate_i weights at its segment
    mask_np = np.zeros((n_rows, cin_pad), np.float32)  # row i: one-hot segment mask
    gb_vec = jnp.zeros((1, gb_lanes), f32)
    off = 0
    for i, d in enumerate(dims):
        gw_mat = gw_mat.at[i, off:off + d].set(gate_ws[i].reshape(-1).astype(f32))
        mask_np[i, off:off + d] = 1.0
        gb_vec = gb_vec.at[0, i].set(gate_bs[i].reshape(()).astype(f32))
        off += d
    seg_mask = jnp.asarray(mask_np)

    w1p = jnp.zeros((cin_pad, h_pad), compute_dtype).at[:sum_dims, :hidden].set(
        w1.astype(compute_dtype))
    b1p = jnp.zeros((1, h_pad), f32).at[0, :hidden].set(b1.astype(f32))
    w2p = jnp.zeros((h_pad, out_pad), compute_dtype).at[:hidden, :out_size].set(
        w2.astype(compute_dtype))
    b2p = jnp.zeros((1, out_pad), f32).at[0, :out_size].set(b2.astype(f32))

    grid = (b_pad // block_rows,)

    def resident(shape):
        # Constant block index across the grid -> stays VMEM-resident (no re-DMA).
        return pl.BlockSpec(shape, lambda i: (0, 0))

    out = pl.pallas_call(
        _make_kernel(n, compute_dtype),
        out_shape=jax.ShapeDtypeStruct((b_pad, out_pad), xs[0].dtype),
        grid=grid,
        in_specs=[
            pl.BlockSpec((block_rows, cin_pad), lambda i: (i, 0)),  # activations
            resident((n_rows, cin_pad)),                            # gate weights (masked rows)
            resident((n_rows, cin_pad)),                            # segment lane masks
            resident((1, gb_lanes)),                                # gate biases
            resident((cin_pad, h_pad)),                             # W1 (padded)
            resident((1, h_pad)),                                   # b1
            resident((h_pad, out_pad)),                             # W2 (padded)
            resident((1, out_pad)),                                 # b2
        ],
        out_specs=pl.BlockSpec((block_rows, out_pad), lambda i: (i, 0)),
        compiler_params=pltpu.CompilerParams(
            # The batch axis is embarrassingly parallel (splits across the
            # two TensorCores on v7x; harmless elsewhere).
            dimension_semantics=("parallel",),
        ),
    )(x_cat, gw_mat, seg_mask, gb_vec, w1p, b1p, w2p, b2p)

    return out[:batch, :out_size]


def _reference(xs, gate_ws, gate_bs, w1, b1, w2, b2, compute_dtype=jnp.float32):
    """Pure-JAX replica of the per-sample PyTorch forward applied to each row,
    mirroring the kernel's matmul-operand dtype."""
    f32 = jnp.float32
    gated = []
    for x, gw, gb in zip(xs, gate_ws, gate_bs):
        xf = x.astype(f32)
        g = jax.nn.sigmoid(jnp.dot(xf, gw.astype(f32)) + gb.astype(f32))  # (B, 1)
        gated.append(xf * g)
    concat = jnp.concatenate(gated, axis=-1)   # == torch.cat(dim=0) for each 1-D sample
    h = jnp.dot(concat.astype(compute_dtype), w1.astype(compute_dtype),
                preferred_element_type=f32) + b1.astype(f32)
    h = jnp.maximum(h, 0.0)
    out = jnp.dot(h.astype(compute_dtype), w2.astype(compute_dtype),
                  preferred_element_type=f32) + b2.astype(f32)
    return jnp.maximum(out, 0.0)


def _uniform(key, shape, fan_in, dtype=jnp.float32):
    # PyTorch Linear default init: U(-1/sqrt(fan_in), 1/sqrt(fan_in)).
    bound = 1.0 / np.sqrt(fan_in)
    return jax.random.uniform(key, shape, dtype, minval=-bound, maxval=bound)


if __name__ == "__main__":
    dims = [32, 48, 16]       # per-input feature sizes (sum = 96)
    hidden_size = 64
    output_size = 32
    batch = 256               # independent samples -> grid of 2 row-blocks of 128
    dtype = jnp.float32

    key = jax.random.PRNGKey(0)
    num_keys = 3 * len(dims) + 4      # xs + gate_ws + gate_bs + (w1, b1, w2, b2)
    keys = jax.random.split(key, num_keys)
    ki = iter(keys)

    xs = [jax.random.normal(next(ki), (batch, d), dtype) for d in dims]
    gate_ws = [_uniform(next(ki), (d, 1), d, dtype) for d in dims]
    gate_bs = [_uniform(next(ki), (1,), d, dtype) for d in dims]

    sum_dims = sum(dims)
    w1 = _uniform(next(ki), (sum_dims, hidden_size), sum_dims, dtype)
    b1 = _uniform(next(ki), (hidden_size,), sum_dims, dtype)
    w2 = _uniform(next(ki), (hidden_size, output_size), hidden_size, dtype)
    b2 = _uniform(next(ki), (output_size,), hidden_size, dtype)

    # Tolerances cover MXU default-precision behaviour for f32 operands
    # (possible bf16 passes) and the bf16 operand path.
    TOL = 2e-2

    # f32 MXU operands (portable; matches v5e guidance).
    out_f32 = gated_concat_fusion(xs, gate_ws, gate_bs, w1, b1, w2, b2,
                                  block_rows=128, compute_dtype=jnp.float32)
    out_f32 = jax.block_until_ready(out_f32)
    ref_f32 = jax.block_until_ready(
        _reference(xs, gate_ws, gate_bs, w1, b1, w2, b2, jnp.float32))
    np.testing.assert_allclose(np.asarray(out_f32), np.asarray(ref_f32),
                               rtol=TOL, atol=TOL)

    # bf16 MXU operands (recommended on v6e/v7x); gate math stays f32.
    out_bf16 = gated_concat_fusion(xs, gate_ws, gate_bs, w1, b1, w2, b2,
                                   block_rows=128, compute_dtype=jnp.bfloat16)
    out_bf16 = jax.block_until_ready(out_bf16)
    ref_bf16 = jax.block_until_ready(
        _reference(xs, gate_ws, gate_bs, w1, b1, w2, b2, jnp.bfloat16))
    np.testing.assert_allclose(np.asarray(out_bf16), np.asarray(ref_bf16),
                               rtol=3e-2, atol=3e-2)

    print("KERNEL_OK")
</pallas_src>

<mosaic_0001>
module attributes {stable_mosaic.version = 11 : i64} {
  func.func @kernel(%arg0: i32, %arg1: memref<128x128xf32, #tpu.memory_space<vmem>>, %arg2: memref<8x128xf32, #tpu.memory_space<vmem>>, %arg3: memref<8x128xf32, #tpu.memory_space<vmem>>, %arg4: memref<1x128xf32, #tpu.memory_space<vmem>>, %arg5: memref<128x128xf32, #tpu.memory_space<vmem>>, %arg6: memref<1x128xf32, #tpu.memory_space<vmem>>, %arg7: memref<128x128xf32, #tpu.memory_space<vmem>>, %arg8: memref<1x128xf32, #tpu.memory_space<vmem>>, %arg9: memref<128x128xf32, #tpu.memory_space<vmem>>) attributes {dimension_semantics = [#tpu.dimension_semantics<parallel>], iteration_bounds = array<i64: 2>, scalar_prefetch = 0 : i64, scratch_operands = 0 : i64, tpu.core_type = #tpu.core_type<tc>, window_params = [{transform_indices = @transform_0, window_bounds = array<i64: 128, 128>}, {pipeline_mode = #tpu.pipeline_mode<synchronous>, transform_indices = @transform_1, window_bounds = array<i64: 8, 128>}, {pipeline_mode = #tpu.pipeline_mode<synchronous>, transform_indices = @transform_2, window_bounds = array<i64: 8, 128>}, {pipeline_mode = #tpu.pipeline_mode<synchronous>, transform_indices = @transform_3, window_bounds = array<i64: 1, 128>}, {pipeline_mode = #tpu.pipeline_mode<synchronous>, transform_indices = @transform_4, window_bounds = array<i64: 128, 128>}, {pipeline_mode = #tpu.pipeline_mode<synchronous>, transform_indices = @transform_5, window_bounds = array<i64: 1, 128>}, {pipeline_mode = #tpu.pipeline_mode<synchronous>, transform_indices = @transform_6, window_bounds = array<i64: 128, 128>}, {pipeline_mode = #tpu.pipeline_mode<synchronous>, transform_indices = @transform_7, window_bounds = array<i64: 1, 128>}, {transform_indices = @transform_8, window_bounds = array<i64: 128, 128>}]} {
    %c0 = arith.constant 0 : index
    %c0_0 = arith.constant 0 : index
    %0 = vector.load %arg1[%c0, %c0_0] : memref<128x128xf32, #tpu.memory_space<vmem>>, vector<128x128xf32>
    %cst = arith.constant 0.000000e+00 : f32
    %1 = vector.broadcast %cst : f32 to vector<128x128xf32>
    %c0_1 = arith.constant 0 : index
    %c0_2 = arith.constant 0 : index
    %2 = vector.load %arg2[%c0_1, %c0_2] : memref<8x128xf32, #tpu.memory_space<vmem>>, vector<1x128xf32>
    %3 = vector.broadcast %2 : vector<1x128xf32> to vector<128x128xf32>
    %4 = arith.mulf %0, %3 : vector<128x128xf32>
    %cst_3 = arith.constant dense<0.000000e+00> : vector<128xf32>
    %5 = vector.multi_reduction <add>, %4, %cst_3 [1] : vector<128x128xf32> to vector<128xf32>
    %6 = vector.shape_cast %5 : vector<128xf32> to vector<128x1xf32>
    %c0_4 = arith.constant 0 : index
    %c0_5 = arith.constant 0 : index
    %7 = vector.load %arg4[%c0_4, %c0_5] : memref<1x128xf32, #tpu.memory_space<vmem>>, vector<1x1xf32>
    %8 = vector.broadcast %7 : vector<1x1xf32> to vector<128x1xf32>
    %9 = arith.addf %6, %8 : vector<128x1xf32>
    %10 = arith.negf %9 : vector<128x1xf32>
    %11 = math.exp %10 : vector<128x1xf32>
    %cst_6 = arith.constant 1.000000e+00 : f32
    %12 = vector.broadcast %cst_6 : f32 to vector<128x1xf32>
    %13 = arith.addf %12, %11 : vector<128x1xf32>
    %14 = arith.divf %12, %13 : vector<128x1xf32>
    %c0_7 = arith.constant 0 : index
    %c0_8 = arith.constant 0 : index
    %15 = vector.load %arg3[%c0_7, %c0_8] : memref<8x128xf32, #tpu.memory_space<vmem>>, vector<1x128xf32>
    %16 = vector.broadcast %14 : vector<128x1xf32> to vector<128x128xf32>
    %17 = vector.broadcast %15 : vector<1x128xf32> to vector<128x128xf32>
    %18 = arith.mulf %16, %17 : vector<128x128xf32>
    %19 = arith.addf %1, %18 : vector<128x128xf32>
    %c1 = arith.constant 1 : index
    %c0_9 = arith.constant 0 : index
    %20 = vector.load %arg2[%c1, %c0_9] : memref<8x128xf32, #tpu.memory_space<vmem>>, vector<1x128xf32>
    %21 = vector.broadcast %20 : vector<1x128xf32> to vector<128x128xf32>
    %22 = arith.mulf %0, %21 : vector<128x128xf32>
    %cst_10 = arith.constant dense<0.000000e+00> : vector<128xf32>
    %23 = vector.multi_reduction <add>, %22, %cst_10 [1] : vector<128x128xf32> to vector<128xf32>
    %24 = vector.shape_cast %23 : vector<128xf32> to vector<128x1xf32>
    %c0_11 = arith.constant 0 : index
    %c1_12 = arith.constant 1 : index
    %25 = vector.load %arg4[%c0_11, %c1_12] : memref<1x128xf32, #tpu.memory_space<vmem>>, vector<1x1xf32>
    %26 = vector.broadcast %25 : vector<1x1xf32> to vector<128x1xf32>
    %27 = arith.addf %24, %26 : vector<128x1xf32>
    %28 = arith.negf %27 : vector<128x1xf32>
    %29 = math.exp %28 : vector<128x1xf32>
    %cst_13 = arith.constant 1.000000e+00 : f32
    %30 = vector.broadcast %cst_13 : f32 to vector<128x1xf32>
    %31 = arith.addf %30, %29 : vector<128x1xf32>
    %32 = arith.divf %30, %31 : vector<128x1xf32>
    %c1_14 = arith.constant 1 : index
    %c0_15 = arith.constant 0 : index
    %33 = vector.load %arg3[%c1_14, %c0_15] : memref<8x128xf32, #tpu.memory_space<vmem>>, vector<1x128xf32>
    %34 = vector.broadcast %32 : vector<128x1xf32> to vector<128x128xf32>
    %35 = vector.broadcast %33 : vector<1x128xf32> to vector<128x128xf32>
    %36 = arith.mulf %34, %35 : vector<128x128xf32>
    %37 = arith.addf %19, %36 : vector<128x128xf32>
    %c2 = arith.constant 2 : index
    %c0_16 = arith.constant 0 : index
    %38 = vector.load %arg2[%c2, %c0_16] : memref<8x128xf32, #tpu.memory_space<vmem>>, vector<1x128xf32>
    %39 = vector.broadcast %38 : vector<1x128xf32> to vector<128x128xf32>
    %40 = arith.mulf %0, %39 : vector<128x128xf32>
    %cst_17 = arith.constant dense<0.000000e+00> : vector<128xf32>
    %41 = vector.multi_reduction <add>, %40, %cst_17 [1] : vector<128x128xf32> to vector<128xf32>
    %42 = vector.shape_cast %41 : vector<128xf32> to vector<128x1xf32>
    %c0_18 = arith.constant 0 : index
    %c2_19 = arith.constant 2 : index
    %43 = vector.load %arg4[%c0_18, %c2_19] : memref<1x128xf32, #tpu.memory_space<vmem>>, vector<1x1xf32>
    %44 = vector.broadcast %43 : vector<1x1xf32> to vector<128x1xf32>
    %45 = arith.addf %42, %44 : vector<128x1xf32>
    %46 = arith.negf %45 : vector<128x1xf32>
    %47 = math.exp %46 : vector<128x1xf32>
    %cst_20 = arith.constant 1.000000e+00 : f32
    %48 = vector.broadcast %cst_20 : f32 to vector<128x1xf32>
    %49 = arith.addf %48, %47 : vector<128x1xf32>
    %50 = arith.divf %48, %49 : vector<128x1xf32>
    %c2_21 = arith.constant 2 : index
    %c0_22 = arith.constant 0 : index
    %51 = vector.load %arg3[%c2_21, %c0_22] : memref<8x128xf32, #tpu.memory_space<vmem>>, vector<1x128xf32>
    %52 = vector.broadcast %50 : vector<128x1xf32> to vector<128x128xf32>
    %53 = vector.broadcast %51 : vector<1x128xf32> to vector<128x128xf32>
    %54 = arith.mulf %52, %53 : vector<128x128xf32>
    %55 = arith.addf %37, %54 : vector<128x128xf32>
    %56 = arith.mulf %0, %55 : vector<128x128xf32>
    %c0_23 = arith.constant 0 : index
    %c0_24 = arith.constant 0 : index
    %57 = vector.load %arg5[%c0_23, %c0_24] : memref<128x128xf32, #tpu.memory_space<vmem>>, vector<128x128xf32>
    %cst_25 = arith.constant dense<0.000000e+00> : vector<128x128xf32>
    %58 = tpu.matmul %56, %57, %cst_25 {dimension_numbers = #tpu.dot_dimension_numbers<[1], [0], [0], [1], [0, 0, 1, 1], [], []>} : vector<128x128xf32>, vector<128x128xf32>, vector<128x128xf32> -> vector<128x128xf32>
    %c0_26 = arith.constant 0 : index
    %c0_27 = arith.constant 0 : index
    %59 = vector.load %arg6[%c0_26, %c0_27] : memref<1x128xf32, #tpu.memory_space<vmem>>, vector<1x128xf32>
    %60 = vector.broadcast %59 : vector<1x128xf32> to vector<128x128xf32>
    %61 = arith.addf %58, %60 : vector<128x128xf32>
    %cst_28 = arith.constant 0.000000e+00 : f32
    %62 = vector.broadcast %cst_28 : f32 to vector<128x128xf32>
    %63 = arith.maximumf %61, %62 : vector<128x128xf32>
    %c0_29 = arith.constant 0 : index
    %c0_30 = arith.constant 0 : index
    %64 = vector.load %arg7[%c0_29, %c0_30] : memref<128x128xf32, #tpu.memory_space<vmem>>, vector<128x128xf32>
    %cst_31 = arith.constant dense<0.000000e+00> : vector<128x128xf32>
    %65 = tpu.matmul %63, %64, %cst_31 {dimension_numbers = #tpu.dot_dimension_numbers<[1], [0], [0], [1], [0, 0, 1, 1], [], []>} : vector<128x128xf32>, vector<128x128xf32>, vector<128x128xf32> -> vector<128x128xf32>
    %c0_32 = arith.constant 0 : index
    %c0_33 = arith.constant 0 : index
    %66 = vector.load %arg8[%c0_32, %c0_33] : memref<1x128xf32, #tpu.memory_space<vmem>>, vector<1x128xf32>
    %67 = vector.broadcast %66 : vector<1x128xf32> to vector<128x128xf32>
    %68 = arith.addf %65, %67 : vector<128x128xf32>
    %cst_34 = arith.constant 0.000000e+00 : f32
    %69 = vector.broadcast %cst_34 : f32 to vector<128x128xf32>
    %70 = arith.maximumf %68, %69 : vector<128x128xf32>
    %c0_35 = arith.constant 0 : index
    %c0_36 = arith.constant 0 : index
    %71 = vector.load %arg9[%c0_35, %c0_36] : memref<128x128xf32, #tpu.memory_space<vmem>>, vector<128x128xf32>
    tpu.vector_store %arg9[%c0_35, %c0_36], %70 {strides = array<i32>} : memref<128x128xf32, #tpu.memory_space<vmem>>, vector<128x128xf32>,
    return
  }
  func.func @transform_0(%arg0: i32) -> (i32, i32) {
    %c0_i32 = arith.constant 0 : i32
    %c0_i32_0 = arith.constant 0 : i32
    return %arg0, %c0_i32 : i32, i32
  }
  func.func @transform_1(%arg0: i32) -> (i32, i32) {
    %c0_i32 = arith.constant 0 : i32
    %c0_i32_0 = arith.constant 0 : i32
    %c0_i32_1 = arith.constant 0 : i32
    return %c0_i32, %c0_i32_0 : i32, i32
  }
  func.func @transform_2(%arg0: i32) -> (i32, i32) {
    %c0_i32 = arith.constant 0 : i32
    %c0_i32_0 = arith.constant 0 : i32
    %c0_i32_1 = arith.constant 0 : i32
    return %c0_i32, %c0_i32_0 : i32, i32
  }
  func.func @transform_3(%arg0: i32) -> (i32, i32) {
    %c0_i32 = arith.constant 0 : i32
    %c0_i32_0 = arith.constant 0 : i32
    %c0_i32_1 = arith.constant 0 : i32
    return %c0_i32, %c0_i32_0 : i32, i32
  }
  func.func @transform_4(%arg0: i32) -> (i32, i32) {
    %c0_i32 = arith.constant 0 : i32
    %c0_i32_0 = arith.constant 0 : i32
    %c0_i32_1 = arith.constant 0 : i32
    return %c0_i32, %c0_i32_0 : i32, i32
  }
  func.func @transform_5(%arg0: i32) -> (i32, i32) {
    %c0_i32 = arith.constant 0 : i32
    %c0_i32_0 = arith.constant 0 : i32
    %c0_i32_1 = arith.constant 0 : i32
    return %c0_i32, %c0_i32_0 : i32, i32
  }
  func.func @transform_6(%arg0: i32) -> (i32, i32) {
    %c0_i32 = arith.constant 0 : i32
    %c0_i32_0 = arith.constant 0 : i32
    %c0_i32_1 = arith.constant 0 : i32
    return %c0_i32, %c0_i32_0 : i32, i32
  }
  func.func @transform_7(%arg0: i32) -> (i32, i32) {
    %c0_i32 = arith.constant 0 : i32
    %c0_i32_0 = arith.constant 0 : i32
    %c0_i32_1 = arith.constant 0 : i32
    return %c0_i32, %c0_i32_0 : i32, i32
  }
  func.func @transform_8(%arg0: i32) -> (i32, i32) {
    %c0_i32 = arith.constant 0 : i32
    %c0_i32_0 = arith.constant 0 : i32
    return %arg0, %c0_i32 : i32, i32
  }
}

</mosaic_0001>

<bundles_post_ra>
// kernel: tpu_custom_call.1
= control target key start
LH: loop header
LB: loop body
LE: loop exit
PB: predicated region body
PF: predicated region fallthrough
CT: control target
= control target key end

     0   :  { %s4548_s0 = inlined_call_operand.hbm [shape: f32[256,128], index: 0, kind: input, shape index: {}]   ;;  %s4549_s1 = inlined_call_operand.hbm [shape: f32[8,128], index: 1, kind: input, shape index: {}]   ;;  %s4550_s2 = inlined_call_operand.hbm [shape: f32[8,128], index: 2, kind: input, shape index: {}]   ;;  %s4551_s3 = inlined_call_operand.vmem [shape: f32[1,128], index: 3, kind: input, shape index: {}]   ;;  %s4552_s4 = inlined_call_operand.hbm [shape: f32[128,128], index: 4, kind: input, shape index: {}]   ;;  %s4553_s5 = inlined_call_operand.vmem [shape: f32[1,128], index: 5, kind: input, shape index: {}]   ;;  %s4554_s6 = inlined_call_operand.hbm [shape: f32[128,128], index: 6, kind: input, shape index: {}]   ;;  %s4555_s7 = inlined_call_operand.vmem [shape: f32[1,128], index: 7, kind: input, shape index: {}]   ;;  %s4556_s8 = inlined_call_operand.hbm [shape: f32[256,128], index: 8, kind: output, shape index: {}]  }
   0x1   :  { %4559 = sst [smem:[#allocation16_spill]] %s4549_s1 }
   0x2   :  { %4560 = sst [smem:[#allocation17_spill]] %s4550_s2 }
   0x3   :  { %13 = vsyncpa [#allocation3], 0 }
   0x4   :  { %15 = vsyncpa [#allocation3 + $0x1], 0 }
   0x5   :  { %16 = vsyncpa [#allocation6], 0 }
   0x6   :  { %17 = vsyncpa [#allocation9], 0 }
   0x7   :  { %18 = vsyncpa [#allocation4], 0 }
   0x8   :  { %20 = vsyncpa [#allocation4 + $0x1], 0  ;;  %s2928_s27 = smov 0   ;;  %s2930_s28 = smov 0  }
   0x9   :  { %s2932_s29 = smov 0   ;;  %s2934_s30 = smov 0  }
   0xa LB: > { %s2949_s9 = sadd.s32 4294967295, %s2870_s30   ;;  %s2223_s10 = sadd.s32 4294967294, %s2870_s30   ;;  %s2870_s30 = sphi %s2934_s30, %s4677_s30   ;;  %s2866_s29 = sphi %s2932_s29, %s4676_s29   ;;  %s2862_s28 = sphi %s2930_s28, %s4675_s28   ;;  %s2858_s27 = sphi %s2928_s27, %s4674_s27  }
   0xb   : > { %p46_p0 = scmp.ne.s32.totalorder %s2862_s28, %s2858_s27  ;;  %p47_p1 = scmp.eq.s32.totalorder %s2949_s9, 0 }
   0xc   : > { %p217_p2 = scmp.eq.s32.totalorder %s2949_s9, 1  ;;  %p223_p3 = scmp.eq.s32.totalorder %s2223_s10, 1 }
   0xd   : > { %p2958_p4 = por %p47_p1, %p46_p0  ;;  %p2224_p5 = scmp.ge.s32.totalorder %s2870_s30, 1 }
   0xe   : > { %p2963_p6 = por %p223_p3, %p46_p0  ;;  %p230_p7 = scmp.lt.s32.totalorder %s2870_s30, 3 }
   0xf   : > { %s4563_s1 = sld [smem:[#allocation16_spill]]  ;;  %s2872_s17 = smov [#allocation5]  }
  0x10   : > { %p2971_p8 = pnand %p2224_p5, %p230_p7  ;;  %s244_s18 = sshll.u32 %s2872_s17, 4  ;;  %s245_s18 = int_to_ptr.vmem [resolvable:$true] %s244_s18 }
  0x11   : > { %s268_s21 = sshll.u32 %s4552_s4, 4  ;;  %s2873_s23 = smov [#allocation8]   ;;  %s269_s21 = int_to_ptr.hbm [resolvable:$true] %s268_s21 }
  0x12   : > { %p2347_p10 = pneg %p2971_p8  ;;  %s270_s24 = sshll.u32 %s2873_s23, 4  ;;  %s271_s24 = int_to_ptr.vmem [resolvable:$true] %s270_s24 }
  0x13   : > { %s4557_s25 = smov 128   ;;  %s4558_s26 = smov 8  }
  0x14   : > { %p2983_p11 = pnand %p2347_p10, %p47_p1  ;;  %s4566_s2 = sld [smem:[#allocation17_spill]] }
  0x15   : > { %s242_s15 = sshll.u32 %s4563_s1, 4  ;;  %s285_s20 = sshll.u32 %s4554_s6, 4  ;;  %s243_s15 = int_to_ptr.hbm [resolvable:$true] %s242_s15  ;;  %s286_s20 = int_to_ptr.hbm [resolvable:$true] %s285_s20 }
  0x16   : > { %2350 = dma.hbm_to_vmem [thread:$0]  (!%p2983_p11), %s243_s15, 128, %s245_s18, [#allocation6]  }
  0x17   : > { %2356 = dma.hbm_to_vmem [thread:$0]  (!%p2983_p11), %s269_s21, 2048, %s271_s24, [#allocation9], %s4557_s25, %s4557_s25, %s4558_s26  }
  0x18   : > { %s2876_s15 = smov [#allocation7]   ;;  %s2877_s21 = smov [#allocation10]  }
  0x19   : > { %s256_s17 = sshll.u32 %s2876_s15, 4  ;;  %s287_s23 = sshll.u32 %s2877_s21, 4  ;;  %s257_s17 = int_to_ptr.vmem [resolvable:$true] %s256_s17  ;;  %s288_s23 = int_to_ptr.vmem [resolvable:$true] %s287_s23 }
  0x1a   : > { %s254_s14 = sshll.u32 %s4566_s2, 4  ;;  %s3008_s24 = sadd.s32 1, %s2870_s30   ;;  %s255_s14 = int_to_ptr.hbm [resolvable:$true] %s254_s14 }
  0x1b   : > { %2353 = dma.hbm_to_vmem [thread:$0]  (!%p2983_p11), %s255_s14, 128, %s257_s17, [#allocation6]  }
  0x1c   : > { %2359 = dma.hbm_to_vmem [thread:$0]  (!%p2983_p11), %s286_s20, 2048, %s288_s23, [#allocation9], %s4557_s25, %s4557_s25, %s4558_s26  }
  0x1d   : > { %s33_s10 = sadd.s32 1, %s2866_s29  ;;  %s30_s13 = ssub.s32 %s2870_s30, %s3008_s24 }
  0x1e   : > { %p40_p12 = scmp.ne.s32.totalorder %s2866_s29, %s2862_s28  ;;  %p31_p13 = scmp.eq.s32.totalorder %s30_s13, 0 }
  0x1f   : > { %p41_p0 = scmp.eq.s32.totalorder %s2870_s30, 0  ;;  %p2372_p5 = scmp.lt.s32.totalorder %s2870_s30, 2 }
  0x20   : > { %p3018_p3 = por %p217_p2, %p40_p12  ;;  %s304_s22 = sand.u32 1, %s2866_s29  }
  0x21   : > { %s3024_s15 = scalar_select %p31_p13, %s2866_s29, %s33_s10  }
  0x22   : > { %p42_p7 = por %p41_p0, %p40_p12  ;;  %s2230_s17 = sshll.u32 %s304_s22, 7 }
  0x23   : > { %s2293_s18 = sshll.u32 %s2870_s30, 7  ;;  %s308_s23 = scalar_lea.vmem [#allocation2], %s2230_s17 }
  0x24   : > { %s313_s21 = scalar_lea.hbm %s4548_s0, %s2293_s18  ;;  %s316_s25 = sshll.u32 %s308_s23, 4  ;;  %s317_s25 = int_to_ptr.vmem [resolvable:$true] %s316_s25 }
  0x25   : > { %s314_s13 = sshll.u32 %s313_s21, 4  ;;  %p3031_p2 = pnand %p2372_p5, %p42_p7  ;;  %s315_s13 = int_to_ptr.hbm [resolvable:$true] %s314_s13 }
  0x26   : > { %s305_s10 = scalar_lea.sflag [#allocation3], %s304_s22  ;;  %s2766_s1 = sshra.s32 %s315_s13, 4  ;;  %s2767_s1 = int_to_ptr.hbm [resolvable:$true] %s2766_s1 }
  0x27   : > { %s2768_s2 = scalar_lea.hbm %s2767_s1, 128  ;;  %p2770_p11 = pneg %p3031_p2 }
  0x28   : > { %p2769_p10 = scmp.ne.s32.totalorder %s2767_s1, %s2768_s2  ;;  %s2773_s19 = scalar_lea.hbm %s4548_s0, 256 }
  0x29   : > { %p2774_p0 = scmp.lt.s32.totalorder %s2767_s1, %s4548_s0  ;;  %p2775_p5 = scmp.lt.s32.totalorder %s2773_s19, %s2768_s2 }
  0x2a   : > { %p2771_p12 = pnand %p2770_p11, %p2769_p10 }
  0x2b   : > { %p2776_p7 = por %p2775_p5, %p2774_p0 }
  0x2c   : > { %p2772_p13 = pneg %p2771_p12 }
  0x2e   : > { %p2777_p9 = pnand %p2776_p7, %p2772_p13 }
  0x30   : > { %2780 = shalt.err (!%p2777_p9)
}
  0x31   : > { %s4569_s22 = smov 8   ;;  %s4570_s23 = smov 128  }
  0x32   : > { %2363 = dma.hbm_to_vmem [thread:$0]  (!%p3031_p2), %s315_s13, 2048, %s317_s25, %s305_s10, %s4570_s23, %s4570_s23, %s4569_s22  }
  0x33   : > { %328 = sbr.rel (%p2971_p8) target bundleno = 790 (0x316), region = 52  ;;  %s3051_s18 = sand.u32 (!%p2971_p8), 1, %s2862_s28  }
  0x34   : > { %s2234_s1 = sshll.u32 (!%p2971_p8), %s3051_s18, 7  ;;  %s331_s2 = scalar_lea.sflag (!%p2971_p8), [#allocation3], %s3051_s18 }
  0x35   : > { %s3057_s17 = scalar_lea.vmem (!%p2971_p8), [#allocation2], %s2234_s1 }
  0x38   : > { %2841 = dma.done.wait (%p2958_p4), %s331_s2, 2048  }
  0x39   : > { %2843 = vsyncadd (%p2958_p4), %s331_s2, 4294965248 }
  0x3a   : > { %2845 = dma.done.wait (%p47_p1), [#allocation6], 256  }
  0x3b   : > { %2847 = vsyncadd (%p47_p1), [#allocation6], 4294967040 }
  0x3c   : > { %2849 = dma.done.wait (%p47_p1), [#allocation9], 4096  }
  0x3d   : > { %2851 = vsyncadd (%p47_p1), [#allocation9], 4294963200  ;;  %v3072_v0 = vld [vmem:[%s3057_s17 + $0x20] sm:$0xff]  ;;  %v3077_v2 = vld [vmem:[%s3057_s17 + $0x10] sm:$0xff]  ;;  %s4482_s21 = scalar_lea.vmem [#allocation11], %s2234_s1  ;;  %s2294_s22 = sshll.u32 %s2949_s9, 7 }
  0x3e   : > { %v3074_v1 = vld [vmem:[#allocation5] ss:$0 sm:$0xff]  ;;  %v3086_v7 = vld [vmem:[%s3057_s17 + $0x28] sm:$0xff]  ;;  %v3089_v8 = vld [vmem:[%s3057_s17 + $0x18] sm:$0xff]  ;;  %s2108_s2 = scalar_lea.hbm %s4556_s8, %s2294_s22  ;;  %s2097_s9 = scalar_lea.sflag [#allocation4], %s3051_s18 }
  0x3f   : > { %v390_v3 = vld [vmem:[%s3057_s17] sm:$0xff]  ;;  %v412_v4 = vmul.f32 %v3074_v1, %v3072_v0  ;;  %v410_v5 = vmul.f32 %v3074_v1, %v3077_v2  ;;  %v391_v9 = vld [vmem:[%s3057_s17 + $0x8] sm:$0xff]  ;;  %v413_v10 = vmul.f32 %v3074_v1, %v3086_v7  ;;  %v411_v11 = vmul.f32 %v3074_v1, %v3089_v8  ;;  %v3099_v14 = vld [vmem:[%s3057_s17 + $0x38] sm:$0xff]  ;;  %s2111_s11 = sshll.u32 %s2108_s2, 4  ;;  %s2816_s10 = scalar_lea.hbm %s4556_s8, 256  ;;  %s2112_s11 = int_to_ptr.hbm [resolvable:$true] %s2111_s11 }
  0x40   : > { %v408_v6 = vmul.f32 %v3074_v1, %v390_v3  ;;  %v409_v12 = vmul.f32 %v3074_v1, %v391_v9  ;;  %v398_v13 = vld [vmem:[%s3057_s17 + $0x40] sm:$0xff]  ;;  %v3102_v15 = vld [vmem:[%s3057_s17 + $0x30] sm:$0xff]  ;;  %v415_v17 = vmul.f32 %v3074_v1, %v3099_v14  ;;  %v399_v21 = vld [vmem:[%s3057_s17 + $0x48] sm:$0xff]  ;;  %s2810_s16 = sshra.s32 %s2112_s11, 4  ;;  %s2811_s16 = int_to_ptr.hbm [resolvable:$true] %s2810_s16 }
  0x41   : > { %432 = vadd.xlane.f32.xlu2 %v412_v4  ;;  %428 = vadd.xlane.f32.xlu1 %v410_v5  ;;  %v416_v16 = vmul.f32 %v3074_v1, %v398_v13  ;;  %v414_v18 = vmul.f32 %v3074_v1, %v3102_v15  ;;  %v3109_v19 = vld [vmem:[#allocation5 + $0x1] ss:$0 sm:$0xff]  ;;  %v400_v20 = vld [vmem:[%s3057_s17 + $0x50] sm:$0xff]  ;;  %v417_v24 = vmul.f32 %v3074_v1, %v399_v21  ;;  %v401_v25 = vld [vmem:[%s3057_s17 + $0x58] sm:$0xff]  ;;  %s2812_s25 = scalar_lea.hbm %s2811_s16, 128  ;;  %p2817_p9 = scmp.lt.s32.totalorder %s2811_s16, %s4556_s8 }
  0x42   : > { %424 = vadd.xlane.f32.xlu0 %v408_v6  ;;  %v904_v22 = vmul.f32 %v3109_v19, %v398_v13  ;;  %v418_v23 = vmul.f32 %v3074_v1, %v400_v20  ;;  %v3117_v26 = vld [vmem:[#allocation5 + $0x2] ss:$0 sm:$0xff]  ;;  %v905_v27 = vmul.f32 %v3109_v19, %v399_v21  ;;  %v419_v28 = vmul.f32 %v3074_v1, %v401_v25  ;;  %v403_v46 = vld [vmem:[%s3057_s17 + $0x68] sm:$0xff]  ;;  %v404_v53 = vld [vmem:[%s3057_s17 + $0x70] sm:$0xff]  ;;  %p2813_p1 = scmp.ne.s32.totalorder %s2811_s16, %s2812_s25  ;;  %p2818_p2 = scmp.lt.s32.totalorder %s2816_s10, %s2812_s25 }
  0x43   : > { %v1388_v29 = vmul.f32 %v3117_v26, %v398_v13  ;;  %v1380_v30 = vmul.f32 %v3117_v26, %v390_v3  ;;  %v896_v31 = vmul.f32 %v3109_v19, %v390_v3  ;;  %v1389_v32 = vmul.f32 %v3117_v26, %v399_v21  ;;  %v402_v39 = vld [vmem:[%s3057_s17 + $0x60] sm:$0xff]  ;;  %v405_v57 = vld [vmem:[%s3057_s17 + $0x78] sm:$0xff] }
  0x44   : > { %v897_v33 = vmul.f32 %v3109_v19, %v391_v9  ;;  %v1390_v34 = vmul.f32 %v3117_v26, %v400_v20  ;;  %v906_v35 = vmul.f32 %v3109_v19, %v400_v20  ;;  %v907_v36 = vmul.f32 %v3109_v19, %v401_v25  ;;  %p2814_p4 = pnand %p2813_p1, %p3018_p3  ;;  %p2819_p10 = por %p2818_p2, %p2817_p9 }
  0x45   : > { %v1391_v37 = vmul.f32 %v3117_v26, %v401_v25  ;;  %v1381_v38 = vmul.f32 %v3117_v26, %v391_v9  ;;  %v420_v40 = vmul.f32 %v3074_v1, %v402_v39  ;;  %v1382_v41 = vmul.f32 %v3117_v26, %v3077_v2 }
  0x46   : > { %v898_v42 = vmul.f32 %v3109_v19, %v3077_v2  ;;  %v899_v43 = vmul.f32 %v3109_v19, %v3089_v8  ;;  %v1392_v44 = vmul.f32 %v3117_v26, %v402_v39  ;;  %v908_v45 = vmul.f32 %v3109_v19, %v402_v39  ;;  %p2815_p8 = pneg %p2814_p4 }
  0x47   : > { %v909_v47 = vmul.f32 %v3109_v19, %v403_v46  ;;  %v421_v48 = vmul.f32 %v3074_v1, %v403_v46  ;;  %v1383_v49 = vmul.f32 %v3117_v26, %v3089_v8  ;;  %v900_v50 = vmul.f32 %v3109_v19, %v3072_v0 }
  0x48   : > { %v1384_v51 = vmul.f32 %v3117_v26, %v3072_v0  ;;  %v1393_v52 = vmul.f32 %v3117_v26, %v403_v46  ;;  %v910_v54 = vmul.f32 %v3109_v19, %v404_v53  ;;  %v1394_v55 = vmul.f32 %v3117_v26, %v404_v53  ;;  %v3168_v0 = vld [vmem:[%s4551_s3] ss:$0 sm:$0xff]  ;;  %p2820_p11 = pnand %p2819_p10, %p2815_p8 }
  0x49   : > { %434 = vadd.xlane.f32.xlu2 %v413_v10  ;;  %430 = vadd.xlane.f32.xlu1 %v411_v11  ;;  %v422_v56 = vmul.f32 %v3074_v1, %v404_v53  ;;  %v423_v58 = vmul.f32 %v3074_v1, %v405_v57  ;;  %v1385_v59 = vmul.f32 %v3117_v26, %v3086_v7 }
  0x4a   : > { %426 = vadd.xlane.f32.xlu0 %v409_v12  ;;  %v901_v60 = vmul.f32 %v3109_v19, %v3086_v7  ;;  %v902_v61 = vmul.f32 %v3109_v19, %v3102_v15  ;;  %v1395_v62 = vmul.f32 %v3117_v26, %v405_v57  ;;  %v911_v63 = vmul.f32 %v3109_v19, %v405_v57 }
  0x4b   : > { %v903_v4 = vmul.f32 %v3109_v19, %v3099_v14  ;;  %v1386_v6 = vmul.f32 %v3117_v26, %v3102_v15 }
  0x51   : > { %440 = vadd.xlane.f32.xlu2 %v416_v16  ;;  %438 = vadd.xlane.f32.xlu1 %v415_v17  ;;  %v1387_v17 = vmul.f32 %v3117_v26, %v3099_v14 }
  0x52   : > { %436 = vadd.xlane.f32.xlu0 %v414_v18 }
  0x59   : > { %928 = vadd.xlane.f32.xlu2 %v904_v22  ;;  %444 = vadd.xlane.f32.xlu1 %v418_v23 }
  0x5a   : > { %442 = vadd.xlane.f32.xlu0 %v417_v24 }
  0x61   : > { %930 = vadd.xlane.f32.xlu2 %v905_v27  ;;  %446 = vadd.xlane.f32.xlu1 %v419_v28 }
  0x62   : > { %1412 = vadd.xlane.f32.xlu0 %v1388_v29 }
  0x69   : > { %1396 = vadd.xlane.f32.xlu2 %v1380_v30  ;;  %912 = vadd.xlane.f32.xlu1 %v896_v31 }
  0x6a   : > { %1414 = vadd.xlane.f32.xlu0 %v1389_v32 }
  0x71   : > { %914 = vadd.xlane.f32.xlu2 %v897_v33  ;;  %1416 = vadd.xlane.f32.xlu1 %v1390_v34  ;;  %v2878_v33 = vmov 0  }
  0x72   : > { %932 = vadd.xlane.f32.xlu0 %v906_v35  ;;  %2421 = vset.pattern.permute.xlu2 %v2878_v33 }
  0x79   : > { %934 = vadd.xlane.f32.xlu1 %v907_v36  ;;  %1418 = vadd.xlane.f32.xlu2 %v1391_v37 }
  0x7a   : > { %1398 = vadd.xlane.f32.xlu0 %v1381_v38 }
  0x81   : > { %448 = vadd.xlane.f32.xlu2 %v420_v40  ;;  %1400 = vadd.xlane.f32.xlu1 %v1382_v41 }
  0x82   : > { %916 = vadd.xlane.f32.xlu0 %v898_v42 }
  0x89   : > { %918 = vadd.xlane.f32.xlu2 %v899_v43  ;;  %1420 = vadd.xlane.f32.xlu1 %v1392_v44 }
  0x8a   : > { %936 = vadd.xlane.f32.xlu0 %v908_v45 }
  0x91   : > { %938 = vadd.xlane.f32.xlu2 %v909_v47  ;;  %450 = vadd.xlane.f32.xlu1 %v421_v48 }
  0x92   : > { %1402 = vadd.xlane.f32.xlu0 %v1383_v49 }
  0x99   : > { %920 = vadd.xlane.f32.xlu1 %v900_v50  ;;  %1404 = vadd.xlane.f32.xlu2 %v1384_v51 }
  0x9a   : > { %1422 = vadd.xlane.f32.xlu0 %v1393_v52 }
  0xa1   : > { %940 = vadd.xlane.f32.xlu1 %v910_v54  ;;  %1424 = vadd.xlane.f32.xlu2 %v1394_v55  ;;  %v2879_v54 = vmov 1  }
  0xa2   : > { %452 = vadd.xlane.f32.xlu0 %v422_v56 }
  0xa3   : > { %2422 = vset.pattern.permute.xlu0 %v2879_v54 }
  0xa9   : > { %454 = vadd.xlane.f32.xlu2 %v423_v58  ;;  %1406 = vadd.xlane.f32.xlu1 %v1385_v59 }
  0xaa   : > { %922 = vadd.xlane.f32.xlu0 %v901_v60 }
  0xb1   : > { %924 = vadd.xlane.f32.xlu2 %v902_v61  ;;  %1426 = vadd.xlane.f32.xlu1 %v1395_v62 }
  0xb2   : > { %942 = vadd.xlane.f32.xlu0 %v911_v63 }
  0xb4   : > { %v433_v1 = vpop.xlane.xlu2 %432  ;;  %v429_v2 = vpop.xlane.xlu1 %428 }
  0xb5   : > { %v425_v3 = vpop.xlane.xlu0 %424  ;;  %v464_v7 = vadd.f32 %v3168_v0, %v433_v1  ;;  %v462_v9 = vadd.f32 %v3168_v0, %v429_v2 }
  0xb6   : > { %v460_v5 = vadd.f32 %v3168_v0, %v425_v3 }
  0xb7   : > { %v2244_v10 = vmul.f32 -1.442695, %v464_v7  ;;  %v2242_v18 = vmul.f32 -1.442695, %v462_v9 }
  0xb8   : > { %v2240_v8 = vmul.f32 -1.442695, %v460_v5 }
  0xb9   : > { %926 = vadd.xlane.f32.xlu1 %v903_v4 }
  0xba   : > { %1408 = vadd.xlane.f32.xlu0 %v1386_v6  ;;  %2437 = vpow2.f32 %v2240_v8 }
  0xbb   : > { %2439 = vpow2.f32 %v2244_v10 }
  0xbc   : > { %v435_v11 = vpop.xlane.xlu2 %434  ;;  %v431_v12 = vpop.xlane.xlu1 %430  ;;  %2441 = vpow2.f32 %v2242_v18 }
  0xbd   : > { %v465_v13 = vadd.f32 %v3168_v0, %v435_v11  ;;  %v427_v16 = vpop.xlane.xlu0 %426  ;;  %v463_v15 = vadd.f32 %v3168_v0, %v431_v12 }
  0xbe   : > { %v461_v20 = vadd.f32 %v3168_v0, %v427_v16 }
  0xbf   : > { %v2245_v19 = vmul.f32 -1.442695, %v465_v13  ;;  %v2243_v23 = vmul.f32 -1.442695, %v463_v15 }
  0xc0   : > { %v2438_v21 = vpop.eup %2437  ;;  %v2241_v24 = vmul.f32 -1.442695, %v461_v20 }
  0xc1   : > { %1410 = vadd.xlane.f32.xlu1 %v1387_v17  ;;  %v3182_v22 = vadd.f32 1.0, %v2438_v21  ;;  %2443 = vpow2.f32 %v2245_v19  ;;  %v2440_v29 = vpop.eup %2439 }
  0xc2   : > { %v2442_v34 = vpop.eup %2441  ;;  %v3189_v36 = vadd.f32 1.0, %v2440_v29 }
  0xc3   : > { %2445 = vrcp.f32 %v3182_v22  ;;  %v3193_v39 = vadd.f32 1.0, %v2442_v34  ;;  %vm545_vm0 = vweird.f32 %v3182_v22  ;;  %v551_v8 = vand.u32 2147483648, %v3182_v22 }
  0xc4   : > { %v441_v25 = vpop.xlane.xlu2 %440  ;;  %v439_v27 = vpop.xlane.xlu1 %438  ;;  %2447 = vpow2.f32 %v2243_v23  ;;  %v549_v12 = vand.u32 2147483647, %v3182_v22 }
  0xc5   : > { %v468_v14 = vadd.f32 %v3168_v0, %v441_v25  ;;  %v467_v26 = vadd.f32 %v3168_v0, %v439_v27  ;;  %v437_v28 = vpop.xlane.xlu0 %436  ;;  %2449 = vpow2.f32 %v2241_v24  ;;  %v2880_v27 = vmov 2  }
  0xc6   : > { %v466_v30 = vadd.f32 %v3168_v0, %v437_v28  ;;  %2423 = vset.pattern.permute.xlu1 %v2880_v27  ;;  %vm550_vm4 = vcmp.eq.f32.partialorder %v549_v12, 8.507059e+37 }
  0xc7   : > { %v2248_v31 = vmul.f32 -1.442695, %v468_v14  ;;  %v2247_v32 = vmul.f32 -1.442695, %v467_v26  ;;  %v2444_v35 = vpop.eup %2443  ;;  %v552_v14 = vor.u32 1.1754944e-38, %v551_v8 }
  0xc8   : > { %v2246_v38 = vmul.f32 -1.442695, %v466_v30  ;;  %v3197_v41 = vadd.f32 1.0, %v2444_v35 }
  0xc9   : > { %2451 = vpow2.f32 %v2248_v31  ;;  %v3191_v37 = vpop.eup %2445 }
  0xca   : > { %2453 = vpow2.f32 %v2247_v32  ;;  %v541_v40 = vmul.f32 %v3191_v37, %v3182_v22  ;;  %v2448_v44 = vpop.eup %2447  ;;  %vm546_vm1 = vweird.f32 %v3191_v37 }
  0xcb   : > { %2455 = vrcp.f32 %v3189_v36  ;;  %v2450_v49 = vpop.eup %2449  ;;  %v3206_v55 = vadd.f32 1.0, %v2448_v44  ;;  %vm3240_vm2 = vmor %vm545_vm0, %vm546_vm1 }
  0xcc   : > { %v929_v42 = vpop.xlane.xlu2 %928  ;;  %v445_v43 = vpop.xlane.xlu1 %444  ;;  %v542_v48 = vsub.f32 1.0, %v541_v40  ;;  %2457 = vpow2.f32 %v2246_v38  ;;  %v3211_v59 = vadd.f32 1.0, %v2450_v49 }
  0xcd   : > { %v952_v45 = vadd.f32 %v3168_v0, %v929_v42  ;;  %v470_v46 = vadd.f32 %v3168_v0, %v445_v43  ;;  %v443_v47 = vpop.xlane.xlu0 %442  ;;  %2459 = vrcp.f32 %v3193_v39 }
  0xce   : > { %v469_v50 = vadd.f32 %v3168_v0, %v443_v47  ;;  %2461 = vrcp.f32 %v3197_v41  ;;  %v543_v57 = vmul.f32 %v3191_v37, %v542_v48 }
  0xcf   : > { %v2452_v51 = vpop.eup %2451  ;;  %v2264_v52 = vmul.f32 -1.442695, %v952_v45  ;;  %v2250_v53 = vmul.f32 -1.442695, %v470_v46 }
  0xd0   : > { %v3208_v56 = vadd.f32 1.0, %v2452_v51  ;;  %v2454_v58 = vpop.eup %2453  ;;  %v2249_v60 = vmul.f32 -1.442695, %v469_v50  ;;  %v544_v3 = vadd.f32 %v3191_v37, %v543_v57 }
  0xd1   : > { %2463 = vpow2.f32 %v2264_v52  ;;  %v3214_v61 = vpop.eup %2455  ;;  %v3218_v63 = vadd.f32 1.0, %v2454_v58 }
  0xd2   : > { %2465 = vrcp.f32 %v3208_v56  ;;  %v2458_v62 = vpop.eup %2457  ;;  %v669_v11 = vand.u32 2147483647, %v3208_v56  ;;  %v671_v19 = vand.u32 2147483648, %v3208_v56  ;;  %v548_v23 = vsel %vm3240_vm2, %v3191_v37, %v544_v3 }
  0xd3   : > { %2467 = vpow2.f32 %v2250_v53  ;;  %v3222_v4 = vpop.eup %2459  ;;  %v3233_v16 = vadd.f32 1.0, %v2458_v62  ;;  %vm665_vm3 = vweird.f32 %v3208_v56  ;;  %v3265_v31 = vsel %vm550_vm4, %v552_v14, %v548_v23 }
  0xd4   : > { %2469 = vrcp.f32 %v3206_v55  ;;  %v931_v1 = vpop.xlane.xlu2 %930  ;;  %v447_v2 = vpop.xlane.xlu1 %446  ;;  %vm3261_vm5 = vcmp.eq.f32.partialorder %v669_v11, 8.507059e+37  ;;  %v672_v38 = vor.u32 1.1754944e-38, %v671_v19 }
  0xd5   : > { %2471 = vrcp.f32 %v3211_v59  ;;  %v953_v5 = vadd.f32 %v3168_v0, %v931_v1  ;;  %v471_v6 = vadd.f32 %v3168_v0, %v447_v2  ;;  %v1413_v7 = vpop.xlane.xlu0 %1412  ;;  %v3228_v9 = vpop.eup %2461 }
  0xd6   : > { %2473 = vpow2.f32 %v2249_v60  ;;  %v1436_v10 = vadd.f32 %v3168_v0, %v1413_v7 }
  0xd7   : > { %v2464_v13 = vpop.eup %2463  ;;  %v2265_v17 = vmul.f32 -1.442695, %v953_v5  ;;  %v2251_v18 = vmul.f32 -1.442695, %v471_v6  ;;  %2475 = vrcp.f32 %v3218_v63 }
  0xd8   : > { %v3244_v20 = vpop.eup %2465  ;;  %v3247_v21 = vadd.f32 1.0, %v2464_v13  ;;  %v2280_v25 = vmul.f32 -1.442695, %v1436_v10 }
  0xd9   : > { %v2468_v24 = vpop.eup %2467  ;;  %2477 = vpow2.f32 %v2265_v17  ;;  %v661_v22 = vmul.f32 %v3244_v20, %v3208_v56  ;;  %vm666_vm6 = vweird.f32 %v3244_v20 }
  0xda   : > { %v3255_v26 = vpop.eup %2469  ;;  %2479 = vrcp.f32 %v3247_v21  ;;  %v3268_v34 = vadd.f32 1.0, %v2468_v24  ;;  %v1153_v40 = vand.u32 2147483647, %v3247_v21  ;;  %vm1149_vm7 = vweird.f32 %v3247_v21  ;;  %vm667_vm8 = vmor %vm665_vm3, %vm666_vm6 }
  0xdb   : > { %v3259_v28 = vpop.eup %2471  ;;  %2481 = vpow2.f32 %v2251_v18  ;;  %v662_v29 = vsub.f32 1.0, %v661_v22  ;;  %v1155_v52 = vand.u32 2147483648, %v3247_v21 }
  0xdc   : > { %v2474_v32 = vpop.eup %2473  ;;  %2483 = vrcp.f32 %v3233_v16  ;;  %v1397_v35 = vpop.xlane.xlu2 %1396  ;;  %v3289_v60 = vmul.f32 %v3259_v28, %v3211_v59  ;;  %vm3296_vm9 = vcmp.eq.f32.partialorder %v1153_v40, 8.507059e+37 }
  0xdd   : > { %v913_v37 = vpop.xlane.xlu1 %912  ;;  %v3271_v42 = vadd.f32 1.0, %v2474_v32  ;;  %2485 = vpow2.f32 %v2280_v25  ;;  %v1428_v43 = vadd.f32 %v3168_v0, %v1397_v35  ;;  %v1415_v45 = vpop.xlane.xlu0 %1414  ;;  %v663_v48 = vmul.f32 %v3244_v20, %v662_v29 }
  0xde   : > { %v944_v44 = vadd.f32 %v3168_v0, %v913_v37  ;;  %v3275_v46 = vpop.eup %2475  ;;  %v1437_v47 = vadd.f32 %v3168_v0, %v1415_v45  ;;  %v1156_v19 = vor.u32 1.1754944e-38, %v1155_v52 }
  0xdf   : > { %v2478_v49 = vpop.eup %2477  ;;  %2487 = vrcp.f32 %v3271_v42  ;;  %v2272_v50 = vmul.f32 -1.442695, %v1428_v43  ;;  %v664_v58 = vadd.f32 %v3244_v20, %v663_v48  ;;  %v684_v7 = vand.u32 2147483647, %v3271_v42 }
  0xe0   : > { %v2256_v51 = vmul.f32 -1.442695, %v944_v44  ;;  %v2480_v53 = vpop.eup %2479  ;;  %2489 = vrcp.f32 %v3268_v34  ;;  %v3284_v57 = vadd.f32 1.0, %v2478_v49  ;;  %v2281_v1 = vmul.f32 -1.442695, %v1437_v47 }
  0xe1   : > { %v2482_v62 = vpop.eup %2481  ;;  %2491 = vpow2.f32 %v2272_v50  ;;  %v1145_v2 = vmul.f32 %v2480_v53, %v3247_v21  ;;  %v668_v6 = vsel %vm667_vm8, %v3244_v20, %v664_v58  ;;  %v686_v8 = vand.u32 2147483648, %v3271_v42 }
  0xe2   : > { %v3300_v5 = vpop.eup %2483  ;;  %2493 = vrcp.f32 %v3284_v57  ;;  %v3306_v11 = vadd.f32 1.0, %v2482_v62  ;;  %v673_v56 = vsel %vm3261_vm5, %v672_v38, %v668_v6  ;;  %vm1150_vm10 = vweird.f32 %v2480_v53 }
  0xe3   : > { %v2486_v10 = vpop.eup %2485  ;;  %2495 = vpow2.f32 %v2256_v51  ;;  %v1146_v12 = vsub.f32 1.0, %v1145_v2  ;;  %823 = vperm.xlu2 %2421, %v673_v56   ;;  %vm680_vm11 = vweird.f32 %v3271_v42  ;;  %vm3320_vm12 = vcmp.eq.f32.partialorder %v684_v7, 8.507059e+37  ;;  %vm1151_vm13 = vmor %vm1149_vm7, %vm1150_vm10 }
  0xe4   : > { %v3310_v13 = vadd.f32 1.0, %v2486_v10  ;;  %v915_v17 = vpop.xlane.xlu2 %914  ;;  %2497 = vpow2.f32 %v2281_v1  ;;  %v687_v32 = vor.u32 1.1754944e-38, %v686_v8  ;;  %vm1164_vm15 = vweird.f32 %v3284_v57 }
  0xe5   : > { %v1417_v18 = vpop.xlane.xlu1 %1416  ;;  %v2488_v15 = vpop.eup %2487  ;;  %v945_v20 = vadd.f32 %v3168_v0, %v915_v17  ;;  %v1147_v25 = vmul.f32 %v2480_v53, %v1146_v12  ;;  %v1168_v1 = vand.u32 2147483647, %v3284_v57 }
  0xe6   : > { %v1438_v23 = vadd.f32 %v3168_v0, %v1417_v18  ;;  %v933_v24 = vpop.xlane.xlu0 %932  ;;  %v3315_v22 = vpop.eup %2489  ;;  %2499 = vrcp.f32 %v3310_v13  ;;  %v676_v29 = vmul.f32 %v2488_v15, %v3271_v42  ;;  %vm681_vm14 = vweird.f32 %v2488_v15 }
  0xe7   : > { %v954_v14 = vadd.f32 %v3168_v0, %v933_v24  ;;  %v2492_v35 = vpop.eup %2491  ;;  %2501 = vrcp.f32 %v3306_v11  ;;  %v2257_v37 = vmul.f32 -1.442695, %v945_v20  ;;  %v1148_v40 = vadd.f32 %v2480_v53, %v1147_v25  ;;  %vm682_vm1 = vmor %vm680_vm11, %vm681_vm14 }
  0xe8   : > { %v2282_v38 = vmul.f32 -1.442695, %v1438_v23  ;;  %v3325_v43 = vpop.eup %2493  ;;  %v3327_v44 = vadd.f32 1.0, %v2492_v35  ;;  %v677_v47 = vsub.f32 1.0, %v676_v29  ;;  %v1637_v50 = vand.u32 2147483647, %v3310_v13 }
  0xe9   : > { %v2266_v45 = vmul.f32 -1.442695, %v954_v14  ;;  %v2496_v48 = vpop.eup %2495  ;;  %2503 = vpow2.f32 %v2257_v37  ;;  %v1152_v49 = vsel %vm1151_vm13, %v2480_v53, %v1148_v40  ;;  %v1160_v51 = vmul.f32 %v3325_v43, %v3284_v57 }
  0xea   : > { %2505 = vrcp.f32 %v3327_v44  ;;  %v3337_v52 = vadd.f32 1.0, %v2496_v48  ;;  %v1157_v21 = vsel %vm3296_vm9, %v1156_v19, %v1152_v49  ;;  %v678_v58 = vmul.f32 %v2488_v15, %v677_v47  ;;  %v2498_v62 = vpop.eup %2497 }
  0xeb   : > { %2507 = vpow2.f32 %v2282_v38  ;;  %1307 = vperm.xlu0 %2422, %v1157_v21   ;;  %vm1633_vm0 = vweird.f32 %v3310_v13  ;;  %v1639_v53 = vand.u32 2147483648, %v3310_v13  ;;  %v3345_v6 = vadd.f32 1.0, %v2498_v62 }
  0xec   : > { %v2500_v2 = vpop.eup %2499  ;;  %2509 = vrcp.f32 %v3337_v52  ;;  %v679_v7 = vadd.f32 %v2488_v15, %v678_v58  ;;  %v1419_v10 = vpop.xlane.xlu2 %1418  ;;  %v1161_v3 = vsub.f32 1.0, %v1160_v51  ;;  %vm3356_vm2 = vcmp.eq.f32.partialorder %v1637_v50, 8.507059e+37 }
  0xed   : > { %v935_v8 = vpop.xlane.xlu1 %934  ;;  %v3347_v56 = vpop.eup %2501  ;;  %2511 = vpow2.f32 %v2266_v45  ;;  %v1439_v18 = vadd.f32 %v3168_v0, %v1419_v10  ;;  %v1629_v19 = vmul.f32 %v2500_v2, %v3310_v13  ;;  %vm1165_vm3 = vweird.f32 %v3325_v43 }
  0xee   : > { %v955_v12 = vadd.f32 %v3168_v0, %v935_v8  ;;  %v1399_v17 = vpop.xlane.xlu0 %1398  ;;  %v683_v20 = vsel %vm682_vm1, %v2488_v15, %v679_v7  ;;  %2513 = vrcp.f32 %v3345_v6  ;;  %vm1634_vm4 = vweird.f32 %v2500_v2  ;;  %vm1166_vm6 = vmor %vm1164_vm15, %vm1165_vm3 }
  0xef   : > { %v1429_v23 = vadd.f32 %v3168_v0, %v1399_v17  ;;  %v2504_v25 = vpop.eup %2503  ;;  %v688_v42 = vsel %vm3320_vm12, %v687_v32, %v683_v20  ;;  %v1630_v29 = vsub.f32 1.0, %v1629_v19  ;;  %v1162_v38 = vmul.f32 %v3325_v43, %v1161_v3  ;;  %vm1635_vm8 = vmor %vm1633_vm0, %vm1634_vm4 }
  0xf0   : > { %v2267_v14 = vmul.f32 -1.442695, %v955_v12  ;;  %v3364_v35 = vpop.eup %2505  ;;  %v3366_v37 = vadd.f32 1.0, %v2504_v25  ;;  %828 = vperm.xlu2 %2421, %v688_v42   ;;  %v2283_v45 = vmul.f32 -1.442695, %v1439_v18  ;;  %v1170_v48 = vand.u32 2147483648, %v3284_v57 }
  0xf1   : > { %v2273_v15 = vmul.f32 -1.442695, %v1429_v23  ;;  %v2508_v40 = vpop.eup %2507  ;;  %v1631_v47 = vmul.f32 %v2500_v2, %v1630_v29  ;;  %v1640_v32 = vor.u32 1.1754944e-38, %v1639_v53  ;;  %v1163_v50 = vadd.f32 %v3325_v43, %v1162_v38 }
  0xf2   : > { %2515 = vpow2.f32 %v2267_v14  ;;  %v3370_v49 = vpop.eup %2509  ;;  %v3372_v30 = vadd.f32 1.0, %v2508_v40  ;;  %vm3375_vm5 = vcmp.eq.f32.partialorder %v1168_v1, 8.507059e+37  ;;  %v1171_v62 = vor.u32 1.1754944e-38, %v1170_v48 }
  0xf3   : > { %v2512_v21 = vpop.eup %2511  ;;  %2517 = vpow2.f32 %v2273_v15  ;;  %v1632_v58 = vadd.f32 %v2500_v2, %v1631_v47  ;;  %v1025_v7 = vmul.f32 %v3370_v49, %v3337_v52  ;;  %vm1029_vm7 = vweird.f32 %v3337_v52 }
  0xf4   : > { %2519 = vrcp.f32 %v3366_v37  ;;  %v3387_v53 = vadd.f32 1.0, %v2512_v21  ;;  %v1167_v1 = vsel %vm1166_vm6, %v3325_v43, %v1163_v50  ;;  %v449_v8 = vpop.xlane.xlu2 %448  ;;  %v1033_v57 = vand.u32 2147483647, %v3337_v52  ;;  %v3394_v3 = vpop.eup %2513 }
  0xf5   : > { %v1401_v10 = vpop.xlane.xlu1 %1400  ;;  %2521 = vpow2.f32 %v2283_v45  ;;  %v1636_v12 = vsel %vm1635_vm8, %v2500_v2, %v1632_v58  ;;  %v1172_v17 = vsel %vm3375_vm5, %v1171_v62, %v1167_v1  ;;  %v472_v19 = vadd.f32 %v3168_v0, %v449_v8 }
  0xf6   : > { %v917_v18 = vpop.xlane.xlu0 %916  ;;  %2523 = vrcp.f32 %v3387_v53  ;;  %v1641_v13 = vsel %vm3356_vm2, %v1640_v32, %v1636_v12  ;;  %v1430_v20 = vadd.f32 %v3168_v0, %v1401_v10  ;;  %v1026_v25 = vsub.f32 1.0, %v1025_v7 }
  0xf7   : > { %v946_v43 = vadd.f32 %v3168_v0, %v917_v18  ;;  %2525 = vrcp.f32 %v3372_v30  ;;  %1791 = vperm.xlu1 %2423, %v1641_v13   ;;  %v2252_v2 = vmul.f32 -1.442695, %v472_v19  ;;  %v1035_v42 = vand.u32 2147483648, %v3337_v52 }
  0xf8   : > { %v2516_v23 = vpop.eup %2515  ;;  %2424 = vset.pattern.permute.xlu2 %v2879_v54  ;;  %vm1030_vm9 = vweird.f32 %v3370_v49  ;;  %v1644_v24 = vmul.f32 %v3394_v3, %v3345_v6  ;;  %v2274_v38 = vmul.f32 -1.442695, %v1430_v20  ;;  %v1027_v40 = vmul.f32 %v3370_v49, %v1026_v25 }
  0xf9   : > { %v3406_v14 = vadd.f32 1.0, %v2516_v23  ;;  %v2258_v29 = vmul.f32 -1.442695, %v946_v43  ;;  %v2518_v15 = vpop.eup %2517  ;;  %1312 = vperm.xlu2 %2424, %v1172_v17   ;;  %2527 = vpow2.f32 %v2252_v2  ;;  %vm3413_vm10 = vcmp.eq.f32.partialorder %v1033_v57, 8.507059e+37  ;;  %vm1031_vm11 = vmor %vm1029_vm7, %vm1030_vm9 }
  0xfa   : > { %v3417_v47 = vpop.eup %2519  ;;  %v3420_v54 = vadd.f32 1.0, %v2518_v15  ;;  %v1036_v48 = vor.u32 1.1754944e-38, %v1035_v42  ;;  %v1645_v32 = vsub.f32 1.0, %v1644_v24  ;;  %v1028_v51 = vadd.f32 %v3370_v49, %v1027_v40 }
  0xfb   : > { %2529 = vrcp.f32 %v3406_v14  ;;  %v2522_v50 = vpop.eup %2521  ;;  %v1652_v21 = vand.u32 2147483647, %v3345_v6  ;;  %v1654_v58 = vand.u32 2147483648, %v3345_v6  ;;  %vm1648_vm12 = vweird.f32 %v3345_v6 }
  0xfc   : > { %2531 = vpow2.f32 %v2258_v29  ;;  %v3425_v62 = vpop.eup %2523  ;;  %v1646_v7 = vmul.f32 %v3394_v3, %v1645_v32  ;;  %vm1649_vm13 = vweird.f32 %v3394_v3  ;;  %v919_v1 = vpop.xlane.xlu2 %918  ;;  %v3437_v57 = vadd.f32 1.0, %v2522_v50 }
  0xfd   : > { %2533 = vrcp.f32 %v3420_v54  ;;  %v1421_v8 = vpop.xlane.xlu1 %1420  ;;  %v3435_v10 = vpop.eup %2525  ;;  %v1032_v12 = vsel %vm1031_vm11, %v3370_v49, %v1028_v51  ;;  %vm1179_vm14 = vweird.f32 %v3387_v53  ;;  %vm3445_vm15 = vcmp.eq.f32.partialorder %v1652_v21, 8.507059e+37  ;;  %vm1650_vm0 = vmor %vm1648_vm12, %vm1649_vm13 }
  0xfe   : > { %2535 = vpow2.f32 %v2274_v38  ;;  %v937_v17 = vpop.xlane.xlu0 %936  ;;  %v1037_v52 = vsel %vm3413_vm10, %v1036_v48, %v1032_v12  ;;  %v1647_v19 = vadd.f32 %v3394_v3, %v1646_v7  ;;  %v1655_v49 = vor.u32 1.1754944e-38, %v1654_v58 }
  0xff   : > { %v956_v18 = vadd.f32 %v3168_v0, %v937_v17  ;;  %v2528_v43 = vpop.eup %2527  ;;  %1267 = vperm.xlu0 %2422, %v1037_v52   ;;  %2426 = vset.pattern.permute.xlu1 %v2878_v33  ;;  %v947_v20 = vadd.f32 %v3168_v0, %v919_v1  ;;  %v1440_v23 = vadd.f32 %v3168_v0, %v1421_v8  ;;  %v1183_v6 = vand.u32 2147483647, %v3387_v53 }
 0x100   : > { %v1175_v2 = vmul.f32 %v3425_v62, %v3387_v53  ;;  %v3460_v42 = vadd.f32 1.0, %v2528_v43  ;;  %783 = vperm.xlu1 %2426, %v3265_v31   ;;  %v1651_v29 = vsel %vm1650_vm0, %v3394_v3, %v1647_v19  ;;  %2537 = vrcp.f32 %v3437_v57 }
 0x101   : > { %v3458_v25 = vpop.eup %2529  ;;  %v2268_v33 = vmul.f32 -1.442695, %v956_v18  ;;  %2425 = vset.pattern.permute.xlu2 %v2880_v27  ;;  %v1656_v15 = vsel %vm3445_vm15, %v1655_v49, %v1651_v29  ;;  %v2259_v38 = vmul.f32 -1.442695, %v947_v20  ;;  %vm695_vm1 = vweird.f32 %v3268_v34 }
 0x102   : > { %v2532_v24 = vpop.eup %2531  ;;  %v1176_v40 = vsub.f32 1.0, %v1175_v2  ;;  %2539 = vrcp.f32 %v3460_v42  ;;  %1796 = vperm.xlu2 %2425, %v1656_v15   ;;  %vm1180_vm2 = vweird.f32 %v3425_v62  ;;  %v1185_v3 = vand.u32 2147483648, %v3387_v53 }
 0x103   : > { %v3470_v45 = vpop.eup %2533  ;;  %v3472_v31 = vadd.f32 1.0, %v2532_v24  ;;  %2541 = vpow2.f32 %v2268_v33  ;;  %v2284_v32 = vmul.f32 -1.442695, %v1440_v23  ;;  %v691_v51 = vmul.f32 %v3315_v22, %v3268_v34  ;;  %vm1181_vm5 = vmor %vm1179_vm14, %vm1180_vm2 }
 0x104   : > { %v2536_v48 = vpop.eup %2535  ;;  %v1177_v50 = vmul.f32 %v3425_v62, %v1176_v40  ;;  %vm3483_vm3 = vcmp.eq.f32.partialorder %v1183_v6, 8.507059e+37  ;;  %vm696_vm4 = vweird.f32 %v3315_v22  ;;  %v701_v8 = vand.u32 2147483648, %v3268_v34  ;;  %v939_v18 = vpop.xlane.xlu2 %938 }
 0x105   : > { %2543 = vrcp.f32 %v3472_v31  ;;  %v3481_v21 = vadd.f32 1.0, %v2536_v48  ;;  %v692_v1 = vsub.f32 1.0, %v691_v51  ;;  %v1186_v12 = vor.u32 1.1754944e-38, %v1185_v3  ;;  %v451_v19 = vpop.xlane.xlu1 %450  ;;  %vm697_vm8 = vmor %vm695_vm1, %vm696_vm4 }
 0x106   : > { %2545 = vpow2.f32 %v2259_v38  ;;  %v1178_v7 = vadd.f32 %v3425_v62, %v1177_v50  ;;  %v699_v17 = vand.u32 2147483647, %v3268_v34  ;;  %v1509_v52 = vmul.f32 %v3364_v35, %v3327_v44  ;;  %v3498_v13 = vpop.eup %2537  ;;  %v1403_v20 = vpop.xlane.xlu0 %1402 }
 0x107   : > { %2547 = vrcp.f32 %v3481_v21  ;;  %v693_v49 = vmul.f32 %v3315_v22, %v692_v1  ;;  %vm1513_vm6 = vweird.f32 %v3327_v44  ;;  %v702_v2 = vor.u32 1.1754944e-38, %v701_v8 }
 0x108   : > { %2549 = vpow2.f32 %v2284_v32  ;;  %v1182_v43 = vsel %vm1181_vm5, %v3425_v62, %v1178_v7  ;;  %v3503_v53 = vpop.eup %2539  ;;  %v1510_v33 = vsub.f32 1.0, %v1509_v52  ;;  %vm1514_vm7 = vweird.f32 %v3364_v35 }
 0x109   : > { %v1187_v23 = vsel %vm3483_vm3, %v1186_v12, %v1182_v43  ;;  %v2542_v29 = vpop.eup %2541  ;;  %v694_v6 = vadd.f32 %v3315_v22, %v693_v49  ;;  %v1519_v62 = vand.u32 2147483648, %v3327_v44  ;;  %v957_v24 = vadd.f32 %v3168_v0, %v939_v18  ;;  %vm1515_vm10 = vmor %vm1513_vm6, %vm1514_vm7 }
 0x10a   : > { %1317 = vperm.xlu0 %2422, %v1187_v23   ;;  %v473_v15 = vadd.f32 %v3168_v0, %v451_v19  ;;  %v3514_v40 = vadd.f32 1.0, %v2542_v29  ;;  %v1511_v3 = vmul.f32 %v3364_v35, %v1510_v33  ;;  %v1517_v48 = vand.u32 2147483647, %v3327_v44 }
 0x10b   : > { %v3512_v38 = vpop.eup %2543  ;;  %v1431_v32 = vadd.f32 %v3168_v0, %v1403_v20  ;;  %v698_v51 = vsel %vm697_vm8, %v3315_v22, %v694_v6  ;;  %vm700_vm9 = vcmp.eq.f32.partialorder %v699_v17, 8.507059e+37  ;;  %v2269_v58 = vmul.f32 -1.442695, %v957_v24 }
 0x10c   : > { %v2546_v50 = vpop.eup %2545  ;;  %v2253_v7 = vmul.f32 -1.442695, %v473_v15  ;;  %2551 = vrcp.f32 %v3514_v40  ;;  %v703_v34 = vsel %vm700_vm9, %v702_v2, %v698_v51  ;;  %v1512_v12 = vadd.f32 %v3364_v35, %v1511_v3 }
 0x10d   : > { %v3524_v1 = vpop.eup %2547  ;;  %v3527_v8 = vadd.f32 1.0, %v2546_v50  ;;  %833 = vperm.xlu1 %2426, %v703_v34   ;;  %v1520_v22 = vor.u32 1.1754944e-38, %v1519_v62  ;;  %2553 = vpow2.f32 %v2269_v58  ;;  %v2275_v17 = vmul.f32 -1.442695, %v1431_v32 }
 0x10e   : > { %v2550_v52 = vpop.eup %2549  ;;  %v1040_v18 = vmul.f32 %v3417_v47, %v3366_v37  ;;  %v1516_v43 = vsel %vm1515_vm10, %v3364_v35, %v1512_v12  ;;  %vm1518_vm11 = vcmp.eq.f32.partialorder %v1517_v48, 8.507059e+37  ;;  %v1048_v23 = vand.u32 2147483647, %v3366_v37 }
 0x10f   : > { %2555 = vrcp.f32 %v3527_v8  ;;  %v3537_v19 = vadd.f32 1.0, %v2550_v52  ;;  %v1521_v49 = vsel %vm1518_vm11, %v1520_v22, %v1516_v43  ;;  %vm1044_vm12 = vweird.f32 %v3366_v37 }
 0x110   : > { %2557 = vpow2.f32 %v2253_v7  ;;  %v1041_v20 = vsub.f32 1.0, %v1040_v18  ;;  %1751 = vperm.xlu2 %2425, %v1521_v49   ;;  %v1050_v44 = vand.u32 2147483648, %v3366_v37  ;;  %v557_v2 = vsub.f32 1.0, %v3289_v60  ;;  %v921_v37 = vpop.xlane.xlu1 %920 }
 0x111   : > { %2559 = vrcp.f32 %v3537_v19  ;;  %vm1045_vm13 = vweird.f32 %v3417_v47  ;;  %vm560_vm14 = vweird.f32 %v3211_v59  ;;  %vm561_vm15 = vweird.f32 %v3259_v28 }
 0x112   : > { %2561 = vpow2.f32 %v2275_v17  ;;  %v1042_v33 = vmul.f32 %v3417_v47, %v1041_v20  ;;  %v3548_v35 = vpop.eup %2551  ;;  %v558_v29 = vmul.f32 %v3259_v28, %v557_v2  ;;  %v564_v6 = vand.u32 2147483647, %v3211_v59  ;;  %vm1046_vm1 = vmor %vm1044_vm12, %vm1045_vm13  ;;  %v1423_v17 = vpop.xlane.xlu0 %1422 }
 0x113   : > { %v566_v62 = vand.u32 2147483648, %v3211_v59  ;;  %v2554_v24 = vpop.eup %2553  ;;  %vm3555_vm0 = vcmp.eq.f32.partialorder %v1048_v23, 8.507059e+37  ;;  %v1051_v3 = vor.u32 1.1754944e-38, %v1050_v44  ;;  %v1659_v48 = vmul.f32 %v3435_v10, %v3372_v30  ;;  %vm562_vm3 = vmor %vm560_vm14, %vm561_vm15 }
 0x114   : > { %v1043_v60 = vadd.f32 %v3417_v47, %v1042_v33  ;;  %v3563_v50 = vadd.f32 1.0, %v2554_v24  ;;  %v559_v51 = vadd.f32 %v3259_v28, %v558_v29  ;;  %vm1663_vm2 = vweird.f32 %v3372_v30 }
 0x115   : > { %v3561_v32 = vpop.eup %2555  ;;  %v567_v58 = vor.u32 1.1754944e-38, %v566_v62  ;;  %v1660_v12 = vsub.f32 1.0, %v1659_v48  ;;  %v1667_v52 = vand.u32 2147483647, %v3372_v30  ;;  %v1669_v22 = vand.u32 2147483648, %v3372_v30 }
 0x116   : > { %v2558_v7 = vpop.eup %2557  ;;  %v1047_v34 = vsel %vm1046_vm1, %v3417_v47, %v1043_v60  ;;  %v563_v47 = vsel %vm562_vm3, %v3259_v28, %v559_v51  ;;  %vm565_vm4 = vcmp.eq.f32.partialorder %v564_v6, 8.507059e+37  ;;  %2563 = vrcp.f32 %v3563_v50 }
 0x117   : > { %v3576_v18 = vpop.eup %2559  ;;  %v3578_v43 = vadd.f32 1.0, %v2558_v7  ;;  %v1052_v49 = vsel %vm3555_vm0, %v1051_v3, %v1047_v34  ;;  %v568_v59 = vsel %vm565_vm4, %v567_v58, %v563_v47  ;;  %v1661_v23 = vmul.f32 %v3435_v10, %v1660_v12 }
 0x118   : > { %v2562_v20 = vpop.eup %2561  ;;  %1272 = vperm.xlu0 %2422, %v1052_v49   ;;  %vm1664_vm5 = vweird.f32 %v3435_v10  ;;  %788 = vperm.xlu1 %2426, %v568_v59   ;;  %vm3588_vm6 = vcmp.eq.f32.partialorder %v1667_v52, 8.507059e+37  ;;  %v948_v33 = vadd.f32 %v3168_v0, %v921_v37  ;;  %v1441_v28 = vadd.f32 %v3168_v0, %v1423_v17  ;;  %v1405_v37 = vpop.xlane.xlu2 %1404 }
 0x119   : > { %v3586_v44 = vadd.f32 1.0, %v2562_v20  ;;  %2565 = vrcp.f32 %v3578_v43  ;;  %v1662_v29 = vadd.f32 %v3435_v10, %v1661_v23  ;;  %v1670_v6 = vor.u32 1.1754944e-38, %v1669_v22  ;;  %vm1665_vm7 = vmor %vm1663_vm2, %vm1664_vm5  ;;  %v941_v59 = vpop.xlane.xlu1 %940 }
 0x11a   : > { %v1190_v62 = vmul.f32 %v3458_v25, %v3406_v14  ;;  %v2260_v24 = vmul.f32 -1.442695, %v948_v33  ;;  %v2285_v60 = vmul.f32 -1.442695, %v1441_v28  ;;  %v1198_v15 = vand.u32 2147483647, %v3406_v14 }
 0x11b   : > { %2567 = vrcp.f32 %v3586_v44  ;;  %v1666_v3 = vsel %vm1665_vm7, %v3435_v10, %v1662_v29  ;;  %v1200_v48 = vand.u32 2147483648, %v3406_v14  ;;  %v706_v51 = vmul.f32 %v3347_v56, %v3306_v11 }
 0x11c   : > { %v1191_v0 = vsub.f32 1.0, %v1190_v62  ;;  %v1671_v58 = vsel %vm3588_vm6, %v1670_v6, %v1666_v3  ;;  %2569 = vpow2.f32 %v2260_v24  ;;  %vm1194_vm8 = vweird.f32 %v3406_v14  ;;  %v3610_v30 = vpop.eup %2563  ;;  %v3641_v62 = vld [vmem:[%s4551_s3] ss:$0 sm:$0xff] }
 0x11d   : > { %vm1195_vm9 = vweird.f32 %v3458_v25  ;;  %1801 = vperm.xlu2 %2425, %v1671_v58   ;;  %2571 = vpow2.f32 %v2285_v60  ;;  %vm3613_vm10 = vcmp.eq.f32.partialorder %v1198_v15, 8.507059e+37  ;;  %v707_v34 = vsub.f32 1.0, %v706_v51 }
 0x11e   : > { %v1192_v10 = vmul.f32 %v3458_v25, %v1191_v0  ;;  %v1201_v12 = vor.u32 1.1754944e-38, %v1200_v48  ;;  %vm710_vm11 = vweird.f32 %v3306_v11  ;;  %v716_v52 = vand.u32 2147483648, %v3306_v11  ;;  %vm1196_vm13 = vmor %vm1194_vm8, %vm1195_vm9  ;;  %v453_v0 = vpop.xlane.xlu0 %452 }
 0x11f   : > { %v1524_v22 = vmul.f32 %v3470_v45, %v3420_v54  ;;  %v3621_v17 = vpop.eup %2565  ;;  %v708_v47 = vmul.f32 %v3347_v56, %v707_v34  ;;  %vm711_vm12 = vweird.f32 %v3347_v56  ;;  %v714_v20 = vand.u32 2147483647, %v3306_v11 }
 0x120   : > { %v1193_v49 = vadd.f32 %v3458_v25, %v1192_v10  ;;  %v717_v2 = vor.u32 1.1754944e-38, %v716_v52  ;;  %vm1528_vm14 = vweird.f32 %v3420_v54  ;;  %vm1529_vm15 = vweird.f32 %v3470_v45  ;;  %vm712_vm0 = vmor %vm710_vm11, %vm711_vm12 }
 0x121   : > { %v3627_v23 = vpop.eup %2567  ;;  %v1525_v33 = vsub.f32 1.0, %v1524_v22  ;;  %v709_v29 = vadd.f32 %v3347_v56, %v708_v47  ;;  %v1534_v6 = vand.u32 2147483648, %v3420_v54  ;;  %v1432_v14 = vadd.f32 %v3641_v62, %v1405_v37  ;;  %vm1530_vm2 = vmor %vm1528_vm14, %vm1529_vm15 }
 0x122   : > { %v1197_v28 = vsel %vm1196_vm13, %v3458_v25, %v1193_v49  ;;  %v2570_v24 = vpop.eup %2569  ;;  %v1532_v15 = vand.u32 2147483647, %v3420_v54  ;;  %v958_v3 = vadd.f32 %v3641_v62, %v941_v59  ;;  %vm715_vm1 = vcmp.eq.f32.partialorder %v714_v20, 8.507059e+37 }
 0x123   : > { %v1202_v60 = vsel %vm3613_vm10, %v1201_v12, %v1197_v28  ;;  %v1526_v25 = vmul.f32 %v3470_v45, %v1525_v33  ;;  %v2572_v48 = vpop.eup %2571  ;;  %v3653_v51 = vadd.f32 1.0, %v2570_v24  ;;  %v713_v58 = vsel %vm712_vm0, %v3347_v56, %v709_v29 }
 0x124   : > { %1322 = vperm.xlu0 %2422, %v1202_v60   ;;  %v2276_v10 = vmul.f32 -1.442695, %v1432_v14  ;;  %v3656_v7 = vadd.f32 1.0, %v2572_v48  ;;  %v718_v34 = vsel %vm715_vm1, %v717_v2, %v713_v58  ;;  %v2270_v12 = vmul.f32 -1.442695, %v958_v3 }
 0x125   : > { %v1527_v11 = vadd.f32 %v3470_v45, %v1526_v25  ;;  %2573 = vrcp.f32 %v3653_v51  ;;  %838 = vperm.xlu1 %2426, %v718_v34   ;;  %v1535_v52 = vor.u32 1.1754944e-38, %v1534_v6  ;;  %v474_v22 = vadd.f32 %v3641_v62, %v453_v0  ;;  %v1425_v6 = vpop.xlane.xlu2 %1424 }
 0x126   : > { %v1055_v56 = vmul.f32 %v3512_v38, %v3472_v31  ;;  %2575 = vrcp.f32 %v3656_v7  ;;  %vm1533_vm3 = vcmp.eq.f32.partialorder %v1532_v15, 8.507059e+37  ;;  %v1063_v49 = vand.u32 2147483647, %v3472_v31 }
 0x127   : > { %v1531_v37 = vsel %vm1530_vm2, %v3470_v45, %v1527_v11  ;;  %2577 = vpow2.f32 %v2276_v10  ;;  %v2254_v20 = vmul.f32 -1.442695, %v474_v22  ;;  %v1065_v54 = vand.u32 2147483648, %v3472_v31 }
 0x128   : > { %v1536_v47 = vsel %vm1533_vm3, %v1535_v52, %v1531_v37  ;;  %v1056_v59 = vsub.f32 1.0, %v1055_v56  ;;  %2579 = vpow2.f32 %v2270_v12  ;;  %v571_v2 = vmul.f32 %v3222_v4, %v3193_v39  ;;  %v923_v12 = vpop.xlane.xlu0 %922 }
 0x129   : > { %1756 = vperm.xlu2 %2425, %v1536_v47   ;;  %2581 = vpow2.f32 %v2254_v20  ;;  %vm1059_vm4 = vweird.f32 %v3472_v31  ;;  %vm1060_vm5 = vweird.f32 %v3512_v38  ;;  %vm3676_vm6 = vcmp.eq.f32.partialorder %v1063_v49, 8.507059e+37 }
 0x12a   : > { %v1057_v33 = vmul.f32 %v3512_v38, %v1056_v59  ;;  %v1066_v28 = vor.u32 1.1754944e-38, %v1065_v54  ;;  %v572_v29 = vsub.f32 1.0, %v571_v2  ;;  %vm576_vm7 = vweird.f32 %v3222_v4  ;;  %vm1061_vm8 = vmor %vm1059_vm4, %vm1060_vm5 }
 0x12b   : > { %v3681_v14 = vpop.eup %2573  ;;  %v579_v60 = vand.u32 2147483647, %v3193_v39  ;;  %v581_v25 = vand.u32 2147483648, %v3193_v39  ;;  %v1674_v31 = vmul.f32 %v3498_v13, %v3437_v57  ;;  %vm1678_vm9 = vweird.f32 %v3437_v57 }
 0x12c   : > { %v1058_v24 = vadd.f32 %v3512_v38, %v1057_v33  ;;  %v3688_v15 = vpop.eup %2575  ;;  %v573_v3 = vmul.f32 %v3222_v4, %v572_v29  ;;  %vm1679_vm10 = vweird.f32 %v3498_v13  ;;  %v1682_v0 = vand.u32 2147483647, %v3437_v57 }
 0x12d   : > { %v2578_v48 = vpop.eup %2577  ;;  %v1675_v10 = vsub.f32 1.0, %v1674_v31  ;;  %v1684_v34 = vand.u32 2147483648, %v3437_v57  ;;  %v1442_v11 = vadd.f32 %v3641_v62, %v1425_v6  ;;  %vm575_vm11 = vweird.f32 %v3193_v39  ;;  %vm3711_vm14 = vmor %vm1678_vm9, %vm1679_vm10 }
 0x12e   : > { %v1062_v58 = vsel %vm1061_vm8, %v3512_v38, %v1058_v24  ;;  %v2580_v52 = vpop.eup %2579  ;;  %v3697_v22 = vadd.f32 1.0, %v2578_v48  ;;  %v574_v37 = vadd.f32 %v3222_v4, %v573_v3  ;;  %vm577_vm12 = vmor %vm575_vm11, %vm576_vm7  ;;  %vm580_vm13 = vcmp.eq.f32.partialorder %v579_v60, 8.507059e+37 }
 0x12f   : > { %v1067_v56 = vsel %vm3676_vm6, %v1066_v28, %v1062_v58  ;;  %v2582_v49 = vpop.eup %2581  ;;  %v582_v38 = vor.u32 1.1754944e-38, %v581_v25  ;;  %v1676_v47 = vmul.f32 %v3498_v13, %v1675_v10  ;;  %v2286_v20 = vmul.f32 -1.442695, %v1442_v11  ;;  %v455_v11 = vpop.xlane.xlu2 %454 }
 0x130   : > { %1277 = vperm.xlu0 %2422, %v1067_v56   ;;  %v578_v59 = vsel %vm577_vm12, %v3222_v4, %v574_v37  ;;  %vm3715_vm15 = vcmp.eq.f32.partialorder %v1682_v0, 8.507059e+37  ;;  %v1685_v2 = vor.u32 1.1754944e-38, %v1684_v34  ;;  %v949_v33 = vadd.f32 %v3641_v62, %v923_v12 }
 0x131   : > { %v3720_v45 = vadd.f32 1.0, %v2580_v52  ;;  %v583_v28 = vsel %vm580_vm13, %v582_v38, %v578_v59  ;;  %v1677_v4 = vadd.f32 %v3498_v13, %v1676_v47  ;;  %v1205_v29 = vmul.f32 %v3548_v35, %v3514_v40 }
 0x132   : > { %2583 = vrcp.f32 %v3697_v22  ;;  %v3726_v57 = vadd.f32 1.0, %v2582_v49  ;;  %793 = vperm.xlu1 %2426, %v583_v28   ;;  %v2261_v6 = vmul.f32 -1.442695, %v949_v33  ;;  %vm1209_vm0 = vweird.f32 %v3514_v40  ;;  %v1407_v33 = vpop.xlane.xlu1 %1406  ;;  %v943_v28 = vpop.xlane.xlu0 %942 }
 0x133   : > { %v1681_v24 = vsel %vm3711_vm14, %v3498_v13, %v1677_v4  ;;  %2585 = vpow2.f32 %v2286_v20  ;;  %v1206_v60 = vsub.f32 1.0, %v1205_v29  ;;  %v1213_v25 = vand.u32 2147483647, %v3514_v40 }
 0x134   : > { %v1686_v31 = vsel %vm3715_vm15, %v1685_v2, %v1681_v24  ;;  %vm1210_vm1 = vweird.f32 %v3548_v35  ;;  %v1215_v3 = vand.u32 2147483648, %v3514_v40  ;;  %v721_v0 = vmul.f32 %v3503_v53, %v3460_v42 }
 0x135   : > { %1806 = vperm.xlu2 %2425, %v1686_v31   ;;  %2587 = vpow2.f32 %v2261_v6  ;;  %v1207_v48 = vmul.f32 %v3548_v35, %v1206_v60  ;;  %vm3740_vm2 = vcmp.eq.f32.partialorder %v1213_v25, 8.507059e+37  ;;  %vm725_vm3 = vweird.f32 %v3460_v42  ;;  %vm1211_vm6 = vmor %vm1209_vm0, %vm1210_vm1 }
 0x136   : > { %v722_v58 = vsub.f32 1.0, %v721_v0  ;;  %vm726_vm4 = vweird.f32 %v3503_v53  ;;  %v729_v10 = vand.u32 2147483647, %v3460_v42  ;;  %v731_v34 = vand.u32 2147483648, %v3460_v42 }
 0x137   : > { %v1208_v12 = vadd.f32 %v3548_v35, %v1207_v48  ;;  %v1216_v52 = vor.u32 1.1754944e-38, %v1215_v3  ;;  %v1539_v56 = vmul.f32 %v3524_v1, %v3481_v21  ;;  %vm1543_vm5 = vweird.f32 %v3481_v21  ;;  %vm3766_vm8 = vmor %vm725_vm3, %vm726_vm4 }
 0x138   : > { %v3752_v37 = vpop.eup %2583  ;;  %v723_v49 = vmul.f32 %v3503_v53, %v722_v58  ;;  %v732_v38 = vor.u32 1.1754944e-38, %v731_v34  ;;  %vm1544_vm7 = vweird.f32 %v3524_v1  ;;  %v1547_v47 = vand.u32 2147483647, %v3481_v21 }
 0x139   : > { %v2586_v20 = vpop.eup %2585  ;;  %v1212_v59 = vsel %vm1211_vm6, %v3548_v35, %v1208_v12  ;;  %v1540_v40 = vsub.f32 1.0, %v1539_v56  ;;  %v1549_v39 = vand.u32 2147483648, %v3481_v21  ;;  %v475_v2 = vadd.f32 %v3641_v62, %v455_v11  ;;  %vm3787_vm10 = vmor %vm1543_vm5, %vm1544_vm7 }
 0x13a   : > { %2589 = vrcp.f32 %v3720_v45  ;;  %v1217_v35 = vsel %vm3740_vm2, %v1216_v52, %v1212_v59  ;;  %v724_v4 = vadd.f32 %v3503_v53, %v723_v49  ;;  %vm730_vm9 = vcmp.eq.f32.partialorder %v729_v10, 8.507059e+37 }
 0x13b   : > { %v2588_v42 = vpop.eup %2587  ;;  %2591 = vrcp.f32 %v3726_v57  ;;  %v3777_v29 = vadd.f32 1.0, %v2586_v20  ;;  %1327 = vperm.xlu0 %2422, %v1217_v35   ;;  %v1541_v6 = vmul.f32 %v3524_v1, %v1540_v40  ;;  %v2255_v24 = vmul.f32 -1.442695, %v475_v2 }
 0x13c   : > { %v728_v60 = vsel %vm3766_vm8, %v3503_v53, %v724_v4  ;;  %v1550_v31 = vor.u32 1.1754944e-38, %v1549_v39  ;;  %v1433_v3 = vadd.f32 %v3641_v62, %v1407_v33  ;;  %v959_v0 = vadd.f32 %v3641_v62, %v943_v28  ;;  %v925_v4 = vpop.xlane.xlu2 %924 }
 0x13d   : > { %v733_v48 = vsel %vm730_vm9, %v732_v38, %v728_v60  ;;  %v1542_v13 = vadd.f32 %v3524_v1, %v1541_v6  ;;  %vm1548_vm11 = vcmp.eq.f32.partialorder %v1547_v47, 8.507059e+37  ;;  %v1070_v53 = vmul.f32 %v3561_v32, %v3527_v8  ;;  %v1427_v60 = vpop.xlane.xlu1 %1426 }
 0x13e   : > { %843 = vperm.xlu1 %2426, %v733_v48   ;;  %2593 = vpow2.f32 %v2255_v24  ;;  %v2277_v58 = vmul.f32 -1.442695, %v1433_v3  ;;  %v2271_v21 = vmul.f32 -1.442695, %v959_v0  ;;  %vm1074_vm12 = vweird.f32 %v3527_v8 }
 0x13f   : > { %v1546_v10 = vsel %vm3787_vm10, %v3524_v1, %v1542_v13  ;;  %v1071_v34 = vsub.f32 1.0, %v1070_v53  ;;  %vm1075_vm13 = vweird.f32 %v3561_v32  ;;  %v1078_v11 = vand.u32 2147483647, %v3527_v8 }
 0x140   : > { %v3802_v12 = vpop.eup %2589  ;;  %2595 = vrcp.f32 %v3777_v29  ;;  %v1551_v52 = vsel %vm1548_vm11, %v1550_v31, %v1546_v10  ;;  %v1080_v56 = vand.u32 2147483648, %v3527_v8  ;;  %v586_v49 = vmul.f32 %v3255_v26, %v3206_v55  ;;  %vm3815_vm14 = vmor %vm1074_vm12, %vm1075_vm13 }
 0x141   : > { %v3808_v38 = vpop.eup %2591  ;;  %v3810_v47 = vadd.f32 1.0, %v2588_v42  ;;  %1761 = vperm.xlu2 %2425, %v1551_v52   ;;  %2597 = vpow2.f32 %v2277_v58  ;;  %v1072_v1 = vmul.f32 %v3561_v32, %v1071_v34  ;;  %vm3819_vm15 = vcmp.eq.f32.partialorder %v1078_v11, 8.507059e+37 }
 0x142   : > { %2599 = vpow2.f32 %v2271_v21  ;;  %v1081_v54 = vor.u32 1.1754944e-38, %v1080_v56  ;;  %v587_v40 = vsub.f32 1.0, %v586_v49  ;;  %vm590_vm0 = vweird.f32 %v3206_v55 }
 0x143   : > { %v1073_v39 = vadd.f32 %v3561_v32, %v1072_v1  ;;  %v596_v2 = vand.u32 2147483648, %v3206_v55  ;;  %v1689_v33 = vmul.f32 %v3576_v18, %v3537_v19  ;;  %vm591_vm1 = vweird.f32 %v3255_v26 }
 0x144   : > { %v2594_v8 = vpop.eup %2593  ;;  %v588_v28 = vmul.f32 %v3255_v26, %v587_v40  ;;  %v594_v35 = vand.u32 2147483647, %v3206_v55  ;;  %vm1693_vm2 = vweird.f32 %v3537_v19  ;;  %vm1694_vm3 = vweird.f32 %v3576_v18  ;;  %vm592_vm4 = vmor %vm590_vm0, %vm591_vm1 }
 0x145   : > { %v1077_v42 = vsel %vm3815_vm14, %v3561_v32, %v1073_v39  ;;  %v1690_v6 = vsub.f32 1.0, %v1689_v33  ;;  %v1697_v24 = vand.u32 2147483647, %v3537_v19  ;;  %v3839_v31 = vadd.f32 1.0, %v2594_v8  ;;  %vm3857_vm6 = vmor %vm1693_vm2, %vm1694_vm3 }
 0x146   : > { %v3837_v25 = vpop.eup %2595  ;;  %v1082_v3 = vsel %vm3819_vm15, %v1081_v54, %v1077_v42  ;;  %v589_v0 = vadd.f32 %v3255_v26, %v588_v28  ;;  %v1699_v48 = vand.u32 2147483648, %v3537_v19  ;;  %2601 = vrcp.f32 %v3810_v47 }
 0x147   : > { %v2598_v13 = vpop.eup %2597  ;;  %1282 = vperm.xlu0 %2422, %v1082_v3   ;;  %v597_v32 = vor.u32 1.1754944e-38, %v596_v2  ;;  %v1691_v53 = vmul.f32 %v3576_v18, %v1690_v6  ;;  %v950_v58 = vadd.f32 %v3641_v62, %v925_v4  ;;  %vm595_vm5 = vcmp.eq.f32.partialorder %v594_v35, 8.507059e+37 }
 0x148   : > { %v2600_v21 = vpop.eup %2599  ;;  %v593_v10 = vsel %vm592_vm4, %v3255_v26, %v589_v0  ;;  %v1700_v11 = vor.u32 1.1754944e-38, %v1699_v48  ;;  %v1443_v55 = vadd.f32 %v3641_v62, %v1427_v60  ;;  %vm1698_vm7 = vcmp.eq.f32.partialorder %v1697_v24, 8.507059e+37 }
 0x149   : > { %v598_v52 = vsel %vm595_vm5, %v597_v32, %v593_v10  ;;  %v1692_v56 = vadd.f32 %v3576_v18, %v1691_v53  ;;  %v2262_v49 = vmul.f32 -1.442695, %v950_v58  ;;  %2603 = vrcp.f32 %v3839_v31  ;;  %v927_v53 = vpop.xlane.xlu1 %926 }
 0x14a   : > { %798 = vperm.xlu1 %2426, %v598_v52   ;;  %v2287_v26 = vmul.f32 -1.442695, %v1443_v55  ;;  %v1220_v1 = vmul.f32 %v3610_v30, %v3563_v50  ;;  %vm1224_vm8 = vweird.f32 %v3563_v50  ;;  %vm1225_vm9 = vweird.f32 %v3610_v30 }
 0x14b   : > { %v1696_v19 = vsel %vm3857_vm6, %v3576_v18, %v1692_v56  ;;  %2605 = vpow2.f32 %v2262_v49  ;;  %v1228_v54 = vand.u32 2147483647, %v3563_v50  ;;  %v1230_v40 = vand.u32 2147483648, %v3563_v50  ;;  %vm3889_vm12 = vmor %vm1224_vm8, %vm1225_vm9 }
 0x14c   : > { %v1701_v20 = vsel %vm1698_vm7, %v1700_v11, %v1696_v19  ;;  %v1221_v59 = vsub.f32 1.0, %v1220_v1  ;;  %v3873_v39 = vpop.eup %2601  ;;  %v3875_v2 = vadd.f32 1.0, %v2598_v13  ;;  %v3877_v33 = vadd.f32 1.0, %v2600_v21  ;;  %v3930_v1 = vpop.permute.xlu2 %823  ;;  %v1891_v21 = vld [vmem:[#allocation8 + $0x68] sm:$0xff] }
 0x14d   : > { %1811 = vperm.xlu2 %2425, %v1701_v20   ;;  %2607 = vpow2.f32 %v2287_v26  ;;  %v736_v18 = vmul.f32 %v3621_v17, %v3578_v43  ;;  %vm740_vm10 = vweird.f32 %v3578_v43  ;;  %vm741_vm11 = vweird.f32 %v3621_v17 }
 0x14e   : > { %v1222_v8 = vmul.f32 %v3610_v30, %v1221_v59  ;;  %v746_v28 = vand.u32 2147483648, %v3578_v43  ;;  %v1231_v4 = vor.u32 1.1754944e-38, %v1230_v40  ;;  %v744_v6 = vand.u32 2147483647, %v3578_v43  ;;  %vm3912_vm0 = vmor %vm740_vm10, %vm741_vm11 }
 0x14f   : > { %v737_v42 = vsub.f32 1.0, %v736_v18  ;;  %v1554_v24 = vmul.f32 %v3627_v23, %v3586_v44  ;;  %v3896_v60 = vpop.eup %2603  ;;  %vm1229_vm13 = vcmp.eq.f32.partialorder %v1228_v54, 8.507059e+37  ;;  %vm1558_vm14 = vweird.f32 %v3586_v44  ;;  %v1893_v18 = vld [vmem:[#allocation8 + $0x78] sm:$0xff] }
 0x150   : > { %v1223_v3 = vadd.f32 %v3610_v30, %v1222_v8  ;;  %vm1559_vm15 = vweird.f32 %v3627_v23  ;;  %v1562_v13 = vand.u32 2147483647, %v3586_v44  ;;  %v1564_v32 = vand.u32 2147483648, %v3586_v44  ;;  %2295 = vmatpush.msra.mxu2 %v1893_v18  ;;  %1898 = vmatpush.msra.mxu0 %v1893_v18 }
 0x151   : > { %v2606_v50 = vpop.eup %2605  ;;  %v738_v0 = vmul.f32 %v3621_v17, %v737_v42  ;;  %v1555_v48 = vsub.f32 1.0, %v1554_v24  ;;  %2609 = vrcp.f32 %v3875_v2  ;;  %v747_v10 = vor.u32 1.1754944e-38, %v746_v28  ;;  %vm3925_vm2 = vmor %vm1558_vm14, %vm1559_vm15 }
 0x152   : > { %v1227_v58 = vsel %vm3889_vm12, %v3610_v30, %v1223_v3  ;;  %v1085_v34 = vmul.f32 %v3681_v14, %v3653_v51  ;;  %vm745_vm1 = vcmp.eq.f32.partialorder %v744_v6, 8.507059e+37  ;;  %2611 = vrcp.f32 %v3877_v33 }
 0x153   : > { %v2608_v11 = vpop.eup %2607  ;;  %v1232_v55 = vsel %vm1229_vm13, %v1231_v4, %v1227_v58  ;;  %v739_v52 = vadd.f32 %v3621_v17, %v738_v0  ;;  %v1556_v56 = vmul.f32 %v3627_v23, %v1555_v48  ;;  %v1565_v30 = vor.u32 1.1754944e-38, %v1564_v32  ;;  %v1892_v48 = vld [vmem:[#allocation8 + $0x70] sm:$0xff] }
 0x154   : > { %1332 = vperm.xlu0 %2422, %v1232_v55   ;;  %v951_v49 = vadd.f32 %v3641_v62, %v927_v53  ;;  %v1086_v26 = vsub.f32 1.0, %v1085_v34  ;;  %vm3936_vm3 = vcmp.eq.f32.partialorder %v1562_v13, 8.507059e+37  ;;  %vm1089_vm4 = vweird.f32 %v3653_v51  ;;  %2296 = vmatpush.msra.mxu2 %v1892_v48  ;;  %v1890_v55 = vld [vmem:[#allocation8 + $0x60] sm:$0xff]  ;;  %v3991_v59 = vpop.permute.xlu2 %828 }
 0x155   : > { %v743_v19 = vsel %vm3912_vm0, %v3621_v17, %v739_v52  ;;  %v1557_v20 = vadd.f32 %v3627_v23, %v1556_v56  ;;  %v3941_v44 = vadd.f32 1.0, %v2606_v50  ;;  %vm1090_vm5 = vweird.f32 %v3681_v14  ;;  %1899 = vmatpush.msra.mxu0 %v1892_v48 }
 0x156   : > { %v748_v54 = vsel %vm745_vm1, %v747_v10, %v743_v19  ;;  %v1087_v40 = vmul.f32 %v3681_v14, %v1086_v26  ;;  %vm3948_vm6 = vmor %vm1089_vm4, %vm1090_vm5  ;;  %v1093_v28 = vand.u32 2147483647, %v3653_v51  ;;  %v1095_v35 = vand.u32 2147483648, %v3653_v51  ;;  %2297 = vmatpush.msra.mxu2 %v1891_v21 }
 0x157   : > { %848 = vperm.xlu1 %2426, %v748_v54   ;;  %v1561_v17 = vsel %vm3925_vm2, %v3627_v23, %v1557_v20  ;;  %v601_v4 = vmul.f32 %v3214_v61, %v3189_v36  ;;  %v3956_v42 = vpop.eup %2609  ;;  %v3958_v6 = vadd.f32 1.0, %v2608_v11  ;;  %v2263_v23 = vmul.f32 -1.442695, %v951_v49  ;;  %v1411_v11 = vpop.xlane.xlu1 %1410  ;;  %1900 = vmatpush.msra.mxu0 %v1891_v21 }
 0x158   : > { %v1566_v24 = vsel %vm3936_vm3, %v1565_v30, %v1561_v17  ;;  %v1088_v3 = vadd.f32 %v3681_v14, %v1087_v40  ;;  %vm1094_vm7 = vcmp.eq.f32.partialorder %v1093_v28, 8.507059e+37  ;;  %v1096_v50 = vor.u32 1.1754944e-38, %v1095_v35  ;;  %v3964_v13 = vpop.eup %2611  ;;  %2298 = vmatpush.msra.mxu2 %v1890_v55  ;;  %v1889_v28 = vld [vmem:[#allocation8 + $0x58] sm:$0xff] }
 0x159   : > { %1766 = vperm.xlu2 %2425, %v1566_v24   ;;  %v602_v0 = vsub.f32 1.0, %v601_v4  ;;  %v609_v51 = vand.u32 2147483647, %v3189_v36  ;;  %2613 = vrcp.f32 %v3941_v44  ;;  %v611_v53 = vand.u32 2147483648, %v3189_v36  ;;  %1901 = vmatpush.msra.mxu0 %v1890_v55  ;;  %v4070_v40 = vld [vmem:[#allocation7] ss:$0 sm:$0xff] }
 0x15a   : > { %v1092_v32 = vsel %vm3948_vm6, %v3681_v14, %v1088_v3  ;;  %v1704_v58 = vmul.f32 %v3688_v15, %v3656_v7  ;;  %vm605_vm8 = vweird.f32 %v3189_v36  ;;  %vm606_vm9 = vweird.f32 %v3214_v61  ;;  %2299 = vmatpush.msra.mxu2 %v1889_v28 }
 0x15b   : > { %v1097_v10 = vsel %vm1094_vm7, %v1096_v50, %v1092_v32  ;;  %v603_v34 = vmul.f32 %v3214_v61, %v602_v0  ;;  %vm1708_vm10 = vweird.f32 %v3656_v7  ;;  %vm1709_vm11 = vweird.f32 %v3688_v15  ;;  %vm607_vm13 = vmor %vm605_vm8, %vm606_vm9  ;;  %1902 = vmatpush.msra.mxu0 %v1889_v28  ;;  %v1881_v28 = vld [vmem:[#allocation8 + $0x18] sm:$0xff] }
 0x15c   : > { %1287 = vperm.xlu0 %2422, %v1097_v10   ;;  %v1705_v52 = vsub.f32 1.0, %v1704_v58  ;;  %v1712_v14 = vand.u32 2147483647, %v3656_v7  ;;  %2615 = vpow2.f32 %v2263_v23  ;;  %vm3980_vm12 = vcmp.eq.f32.partialorder %v609_v51, 8.507059e+37  ;;  %vm3998_vm14 = vmor %vm1708_vm10, %vm1709_vm11 }
 0x15d   : > { %v604_v56 = vadd.f32 %v3214_v61, %v603_v34  ;;  %v1714_v30 = vand.u32 2147483648, %v3656_v7  ;;  %v612_v49 = vor.u32 1.1754944e-38, %v611_v53  ;;  %v1435_v19 = vadd.f32 %v3641_v62, %v1411_v11  ;;  %v1888_v53 = vld [vmem:[#allocation8 + $0x50] sm:$0xff]  ;;  %v1887_v34 = vld [vmem:[#allocation8 + $0x48] sm:$0xff] }
 0x15e   : > { %v1706_v26 = vmul.f32 %v3688_v15, %v1705_v52  ;;  %v1235_v20 = vmul.f32 %v3802_v12, %v3720_v45  ;;  %vm4002_vm15 = vcmp.eq.f32.partialorder %v1712_v14, 8.507059e+37  ;;  %vm1239_vm0 = vweird.f32 %v3720_v45  ;;  %2300 = vmatpush.msra.mxu2 %v1888_v53  ;;  %v1886_v52 = vld [vmem:[#allocation8 + $0x40] sm:$0xff]  ;;  %1903 = vmatpush.msra.mxu0 %v1888_v53 }
 0x15f   : > { %v608_v54 = vsel %vm607_vm13, %v3214_v61, %v604_v56  ;;  %v1715_v18 = vor.u32 1.1754944e-38, %v1714_v30  ;;  %v4007_v17 = vpop.eup %2613  ;;  %vm1240_vm1 = vweird.f32 %v3802_v12  ;;  %2617 = vrcp.f32 %v3958_v6 }
 0x160   : > { %v613_v61 = vsel %vm3980_vm12, %v612_v49, %v608_v54  ;;  %v1707_v8 = vadd.f32 %v3688_v15, %v1706_v26  ;;  %v1236_v7 = vsub.f32 1.0, %v1235_v20  ;;  %v1243_v35 = vand.u32 2147483647, %v3720_v45  ;;  %vm4029_vm3 = vmor %vm1239_vm0, %vm1240_vm1  ;;  %v1409_v26 = vpop.xlane.xlu0 %1408  ;;  %2301 = vmatpush.msra.mxu2 %v1887_v34  ;;  %1904 = vmatpush.msra.mxu0 %v1887_v34 }
 0x161   : > { %803 = vperm.xlu1 %2426, %v613_v61   ;;  %v1245_v4 = vand.u32 2147483648, %v3720_v45  ;;  %v751_v24 = vmul.f32 %v3808_v38, %v3726_v57  ;;  %v2279_v3 = vmul.f32 -1.442695, %v1435_v19  ;;  %vm755_vm2 = vweird.f32 %v3726_v57  ;;  %v4074_v61 = vpop.permute.xlu2 %1312 }
 0x162   : > { %v1711_v23 = vsel %vm3998_vm14, %v3688_v15, %v1707_v8  ;;  %v1237_v50 = vmul.f32 %v3802_v12, %v1236_v7  ;;  %v2616_v0 = vpop.eup %2615  ;;  %vm756_vm4 = vweird.f32 %v3808_v38  ;;  %vm4035_vm5 = vcmp.eq.f32.partialorder %v1243_v35, 8.507059e+37  ;;  %2302 = vmatpush.msra.mxu2 %v1886_v52  ;;  %1905 = vmatpush.msra.mxu0 %v1886_v52 }
 0x163   : > { %v1716_v51 = vsel %vm4002_vm15, %v1715_v18, %v1711_v23  ;;  %v1246_v32 = vor.u32 1.1754944e-38, %v1245_v4  ;;  %v752_v15 = vsub.f32 1.0, %v751_v24  ;;  %v759_v10 = vand.u32 2147483647, %v3726_v57  ;;  %vm4053_vm8 = vmor %vm755_vm2, %vm756_vm4  ;;  %v1885_v4 = vld [vmem:[#allocation8 + $0x38] sm:$0xff] }
 0x164   : > { %1816 = vperm.xlu2 %2425, %v1716_v51   ;;  %v1238_v58 = vadd.f32 %v3802_v12, %v1237_v50  ;;  %v761_v45 = vand.u32 2147483648, %v3726_v57  ;;  %v1569_v55 = vmul.f32 %v3752_v37, %v3697_v22  ;;  %vm1573_vm6 = vweird.f32 %v3697_v22  ;;  %2303 = vmatpush.msra.mxu2 %v1885_v4 }
 0x165   : > { %v753_v11 = vmul.f32 %v3808_v38, %v752_v15  ;;  %vm1574_vm7 = vweird.f32 %v3752_v37  ;;  %vm4057_vm9 = vcmp.eq.f32.partialorder %v759_v10, 8.507059e+37  ;;  %v1577_v49 = vand.u32 2147483647, %v3697_v22  ;;  %v4062_v19 = vpop.eup %2617  ;;  %1906 = vmatpush.msra.mxu0 %v1885_v4  ;;  %v1883_v15 = vld [vmem:[#allocation8 + $0x28] sm:$0xff] }
 0x166   : > { %v1242_v14 = vsel %vm4029_vm3, %v3802_v12, %v1238_v58  ;;  %v762_v30 = vor.u32 1.1754944e-38, %v761_v45  ;;  %v1570_v20 = vsub.f32 1.0, %v1569_v55  ;;  %v1579_v54 = vand.u32 2147483648, %v3697_v22  ;;  %vm4091_vm11 = vmor %vm1573_vm6, %vm1574_vm7 }
 0x167   : > { %v1247_v12 = vsel %vm4035_vm5, %v1246_v32, %v1242_v14  ;;  %v754_v57 = vadd.f32 %v3808_v38, %v753_v11  ;;  %v4068_v36 = vadd.f32 1.0, %v2616_v0  ;;  %2619 = vpow2.f32 %v2279_v3  ;;  %v1884_v32 = vld [vmem:[#allocation8 + $0x30] sm:$0xff]  ;;  %v1882_v11 = vld [vmem:[#allocation8 + $0x20] sm:$0xff] }
 0x168   : > { %1337 = vperm.xlu0 %2422, %v1247_v12   ;;  %v1100_v18 = vmul.f32 %v3873_v39, %v3810_v47  ;;  %v1571_v7 = vmul.f32 %v3752_v37, %v1570_v20  ;;  %vm4080_vm10 = vcmp.eq.f32.partialorder %v1577_v49, 8.507059e+37  ;;  %v1434_v35 = vadd.f32 %v3641_v62, %v1409_v26  ;;  %2304 = vmatpush.msra.mxu2 %v1884_v32 }
 0x169   : > { %v758_v8 = vsel %vm4053_vm8, %v3808_v38, %v754_v57  ;;  %v1580_v38 = vor.u32 1.1754944e-38, %v1579_v54  ;;  %vm1104_vm12 = vweird.f32 %v3810_v47  ;;  %vm1105_vm13 = vweird.f32 %v3873_v39  ;;  %1907 = vmatpush.msra.mxu0 %v1884_v32  ;;  %v4141_v54 = vpop.permute.xlu2 %1796 }
 0x16a   : > { %v763_v24 = vsel %vm4057_vm9, %v762_v30, %v758_v8  ;;  %v1101_v3 = vsub.f32 1.0, %v1100_v18  ;;  %v1572_v62 = vadd.f32 %v3752_v37, %v1571_v7  ;;  %v1108_v50 = vand.u32 2147483647, %v3810_v47  ;;  %vm4113_vm14 = vmor %vm1104_vm12, %vm1105_vm13  ;;  %2305 = vmatpush.msra.mxu2 %v1883_v15 }
 0x16b   : > { %853 = vperm.xlu1 %2426, %v763_v24   ;;  %v1110_v0 = vand.u32 2147483648, %v3810_v47  ;;  %2621 = vrcp.f32 %v4068_v36  ;;  %v4103_v22 = vmul.f32 %v4070_v40, %v3930_v1  ;;  %v616_v48 = vmul.f32 %v3228_v9, %v3197_v41  ;;  %1908 = vmatpush.msra.mxu0 %v1883_v15  ;;  %v4187_v15 = vpop.permute.xlu0 %1307 }
 0x16c   : > { %v1102_v51 = vmul.f32 %v3873_v39, %v1101_v3  ;;  %v1576_v53 = vsel %vm4091_vm11, %v3752_v37, %v1572_v62  ;;  %v2278_v58 = vmul.f32 -1.442695, %v1434_v35  ;;  %vm620_vm15 = vweird.f32 %v3197_v41  ;;  %2306 = vmatpush.msra.mxu2 %v1882_v11 }
 0x16d   : > { %v1111_v1 = vor.u32 1.1754944e-38, %v1110_v0  ;;  %v2620_v10 = vpop.eup %2619  ;;  %v1581_v45 = vsel %vm4080_vm10, %v1580_v38, %v1576_v53  ;;  %vm1109_vm0 = vcmp.eq.f32.partialorder %v1108_v50, 8.507059e+37  ;;  %v617_v37 = vsub.f32 1.0, %v616_v48  ;;  %1909 = vmatpush.msra.mxu0 %v1882_v11  ;;  %v4165_v38 = vpop.permute.xlu1 %1791  ;;  %v1880_v53 = vld [vmem:[#allocation8 + $0x10] sm:$0xff] }
 0x16e   : > { %v1103_v34 = vadd.f32 %v3873_v39, %v1102_v51  ;;  %1771 = vperm.xlu2 %2425, %v1581_v45   ;;  %vm621_vm1 = vweird.f32 %v3228_v9  ;;  %v624_v47 = vand.u32 2147483647, %v3197_v41  ;;  %v626_v55 = vand.u32 2147483648, %v3197_v41  ;;  %2307 = vmatpush.msra.mxu2 %v1881_v28 }
 0x16f   : > { %v1719_v52 = vmul.f32 %v3837_v25, %v3777_v29  ;;  %v618_v56 = vmul.f32 %v3228_v9, %v617_v37  ;;  %vm1723_vm2 = vweird.f32 %v3777_v29  ;;  %vm1724_vm3 = vweird.f32 %v3837_v25  ;;  %vm622_vm4 = vmor %vm620_vm15, %vm621_vm1  ;;  %1910 = vmatpush.msra.mxu0 %v1881_v28  ;;  %v1878_v37 = vld [vmem:[#allocation8] sm:$0xff] }
 0x170   : > { %v1107_v14 = vsel %vm4113_vm14, %v3873_v39, %v1103_v34  ;;  %v1727_v49 = vand.u32 2147483647, %v3777_v29  ;;  %v1729_v26 = vand.u32 2147483648, %v3777_v29  ;;  %v4136_v57 = vadd.f32 1.0, %v2620_v10  ;;  %vm4153_vm6 = vmor %vm1723_vm2, %vm1724_vm3  ;;  %2308 = vmatpush.msra.mxu2 %v1880_v53 }
 0x171   : > { %v1112_v43 = vsel %vm1109_vm0, %v1111_v1, %v1107_v14  ;;  %v1720_v30 = vsub.f32 1.0, %v1719_v52  ;;  %v4134_v12 = vpop.eup %2621  ;;  %2623 = vpow2.f32 %v2278_v58  ;;  %v619_v39 = vadd.f32 %v3228_v9, %v618_v56  ;;  %v1879_v58 = vld [vmem:[#allocation8 + $0x8] sm:$0xff]  ;;  %1911 = vmatpush.msra.mxu0 %v1880_v53 }
 0x172   : > { %1292 = vperm.xlu0 %2422, %v1112_v43   ;;  %v1250_v20 = vmul.f32 %v3964_v13, %v3877_v33  ;;  %vm625_vm5 = vcmp.eq.f32.partialorder %v624_v47, 8.507059e+37  ;;  %v627_v18 = vor.u32 1.1754944e-38, %v626_v55  ;;  %v1730_v7 = vor.u32 1.1754944e-38, %v1729_v26  ;;  %2309 = vmatpush.msra.mxu2 %v1879_v58 }
 0x173   : > { %v1721_v8 = vmul.f32 %v3837_v25, %v1720_v30  ;;  %v623_v35 = vsel %vm622_vm4, %v3228_v9, %v619_v39  ;;  %vm1254_vm7 = vweird.f32 %v3877_v33  ;;  %vm1255_vm8 = vweird.f32 %v3964_v13  ;;  %1912 = vmatpush.msra.mxu0 %v1879_v58  ;;  %v4219_v39 = vpop.permute.xlu2 %1751 }
 0x174   : > { %v1251_v24 = vsub.f32 1.0, %v1250_v20  ;;  %v628_v41 = vsel %vm625_vm5, %v627_v18, %v623_v35  ;;  %vm4160_vm9 = vcmp.eq.f32.partialorder %v1727_v49, 8.507059e+37  ;;  %v1258_v29 = vand.u32 2147483647, %v3877_v33  ;;  %vm4177_vm11 = vmor %vm1254_vm7, %vm1255_vm8  ;;  %2310 = vmatpush.msra.mxu2 %v1878_v37 }
 0x175   : > { %v1722_v23 = vadd.f32 %v3837_v25, %v1721_v8  ;;  %808 = vperm.xlu1 %2426, %v628_v41   ;;  %v1260_v62 = vand.u32 2147483648, %v3877_v33  ;;  %v766_v50 = vmul.f32 %v3896_v60, %v3839_v31  ;;  %vm770_vm10 = vweird.f32 %v3839_v31  ;;  %1913 = vmatpush.msra.mxu0 %v1878_v37  ;;  %v4248_v9 = vpop.permute.xlu1 %783 }
 0x176   : > { %v1252_v3 = vmul.f32 %v3964_v13, %v1251_v24  ;;  %vm4181_vm12 = vcmp.eq.f32.partialorder %v1258_v29, 8.507059e+37  ;;  %vm771_vm13 = vweird.f32 %v3896_v60  ;;  %v774_v32 = vand.u32 2147483647, %v3839_v31 }
 0x177   : > { %v1726_v0 = vsel %vm4153_vm6, %v3837_v25, %v1722_v23  ;;  %v2624_v21 = vpop.eup %2623  ;;  %v1261_v1 = vor.u32 1.1754944e-38, %v1260_v62  ;;  %v767_v10 = vsub.f32 1.0, %v766_v50  ;;  %2625 = vrcp.f32 %v4136_v57  ;;  %vm4209_vm0 = vmor %vm770_vm10, %vm771_vm13 }
 0x178   : > { %v1731_v25 = vsel %vm4160_vm9, %v1730_v7, %v1726_v0  ;;  %v1253_v33 = vadd.f32 %v3964_v13, %v1252_v3  ;;  %v776_v45 = vand.u32 2147483648, %v3839_v31  ;;  %v1584_v34 = vmul.f32 %v3956_v42, %v3875_v2  ;;  %v4334_v7 = vld [vmem:[#allocation7 + $0x2] ss:$0 sm:$0xff] }
 0x179   : > { %1821 = vperm.xlu2 %2425, %v1731_v25   ;;  %vm1588_vm14 = vweird.f32 %v3875_v2  ;;  %v768_v47 = vmul.f32 %v3896_v60, %v767_v10  ;;  %vm1589_vm15 = vweird.f32 %v3956_v42  ;;  %v1592_v55 = vand.u32 2147483647, %v3875_v2 }
 0x17a   : > { %v1257_v11 = vsel %vm4177_vm11, %v3964_v13, %v1253_v33  ;;  %v777_v13 = vor.u32 1.1754944e-38, %v776_v45  ;;  %v1585_v56 = vsub.f32 1.0, %v1584_v34  ;;  %v1594_v43 = vand.u32 2147483648, %v3875_v2  ;;  %vm4234_vm4 = vmor %vm1588_vm14, %vm1589_vm15  ;;  %v4246_v2 = vpop.permute.xlu0 %1267 }
 0x17b   : > { %v1262_v52 = vsel %vm4181_vm12, %v1261_v1, %v1257_v11  ;;  %v4214_v30 = vadd.f32 1.0, %v2624_v21  ;;  %v769_v49 = vadd.f32 %v3896_v60, %v768_v47  ;;  %vm775_vm1 = vcmp.eq.f32.partialorder %v774_v32, 8.507059e+37  ;;  %v4282_v21 = vld [vmem:[#allocation7 + $0x1] ss:$0 sm:$0xff] }
 0x17c   : > { %1342 = vperm.xlu0 %2422, %v1262_v52   ;;  %v1115_v26 = vmul.f32 %v4007_v17, %v3941_v44  ;;  %v1586_v31 = vmul.f32 %v3956_v42, %v1585_v56  ;;  %vm4222_vm2 = vcmp.eq.f32.partialorder %v1592_v55, 8.507059e+37  ;;  %v1595_v18 = vor.u32 1.1754944e-38, %v1594_v43  ;;  %v4304_v52 = vpop.permute.xlu2 %1801 }
 0x17d   : > { %vm1119_vm3 = vweird.f32 %v3941_v44  ;;  %v773_v8 = vsel %vm4209_vm0, %v3896_v60, %v769_v49  ;;  %vm1120_vm5 = vweird.f32 %v4007_v17  ;;  %v1123_v35 = vand.u32 2147483647, %v3941_v44  ;;  %v4240_v4 = vpop.eup %2625 }
 0x17e   : > { %v1116_v28 = vsub.f32 1.0, %v1115_v26  ;;  %v778_v24 = vsel %vm775_vm1, %v777_v13, %v773_v8  ;;  %v1587_v41 = vadd.f32 %v3956_v42, %v1586_v31  ;;  %v1125_v60 = vand.u32 2147483648, %v3941_v44  ;;  %vm4267_vm7 = vmor %vm1119_vm3, %vm1120_vm5 }
 0x17f   : > { %v631_v23 = vmul.f32 %v3300_v5, %v3233_v16  ;;  %v4252_v29 = vmul.f32 %v4070_v40, %v3991_v59  ;;  %2627 = vrcp.f32 %v4214_v30  ;;  %858 = vperm.xlu1 %2426, %v778_v24   ;;  %vm4256_vm6 = vcmp.eq.f32.partialorder %v1123_v35, 8.507059e+37  ;;  %v4322_v49 = vpop.permute.xlu1 %833 }
 0x180   : > { %v1117_v3 = vmul.f32 %v4007_v17, %v1116_v28  ;;  %v1591_v50 = vsel %vm4234_vm4, %v3956_v42, %v1587_v41  ;;  %v1126_v0 = vor.u32 1.1754944e-38, %v1125_v60  ;;  %v639_v48 = vand.u32 2147483647, %v3233_v16 }
 0x181   : > { %v632_v51 = vsub.f32 1.0, %v631_v23  ;;  %v1596_v32 = vsel %vm4222_vm2, %v1595_v18, %v1591_v50  ;;  %v641_v58 = vand.u32 2147483648, %v3233_v16  ;;  %v1734_v42 = vmul.f32 %v4062_v19, %v3958_v6 }
 0x182   : > { %v1118_v53 = vadd.f32 %v4007_v17, %v1117_v3  ;;  %1776 = vperm.xlu2 %2425, %v1596_v32   ;;  %vm635_vm8 = vweird.f32 %v3233_v16  ;;  %vm636_vm9 = vweird.f32 %v3300_v5  ;;  %vm1738_vm10 = vweird.f32 %v3958_v6  ;;  %v4320_v43 = vpop.permute.xlu0 %1317 }
 0x183   : > { %v633_v44 = vmul.f32 %v3300_v5, %v632_v51  ;;  %v1735_v33 = vsub.f32 1.0, %v1734_v42  ;;  %vm1739_vm11 = vweird.f32 %v4062_v19  ;;  %v1742_v1 = vand.u32 2147483647, %v3958_v6  ;;  %vm637_vm13 = vmor %vm635_vm8, %vm636_vm9 }
 0x184   : > { %v1122_v25 = vsel %vm4267_vm7, %v4007_v17, %v1118_v53  ;;  %vm4292_vm12 = vcmp.eq.f32.partialorder %v639_v48, 8.507059e+37  ;;  %v1744_v34 = vand.u32 2147483648, %v3958_v6  ;;  %v642_v17 = vor.u32 1.1754944e-38, %v641_v58  ;;  %vm4311_vm14 = vmor %vm1738_vm10, %vm1739_vm11 }
 0x185   : > { %v1127_v10 = vsel %vm4256_vm6, %v1126_v0, %v1122_v25  ;;  %v634_v16 = vadd.f32 %v3300_v5, %v633_v44  ;;  %v4297_v37 = vpop.eup %2627  ;;  %v1736_v11 = vmul.f32 %v4062_v19, %v1735_v33  ;;  %v1354_v47 = vmul.f32 %v4282_v21, %v4187_v15  ;;  %v2630_v44 = vld [vmem:[%s3057_s17 + $0x40] sm:$0xff] }
 0x186   : > { %1297 = vperm.xlu0 %2422, %v1127_v10   ;;  %v1130_v55 = vmul.f32 %v4134_v12, %v4068_v36  ;;  %vm4315_vm15 = vcmp.eq.f32.partialorder %v1742_v1, 8.507059e+37  ;;  %v1745_v15 = vor.u32 1.1754944e-38, %v1744_v34  ;;  %vm1134_vm0 = vweird.f32 %v4068_v36  ;;  %v1757_v1 = vpop.permute.xlu2 %1756 }
 0x187   : > { %v638_v14 = vsel %vm637_vm13, %v3300_v5, %v634_v16  ;;  %v1737_v6 = vadd.f32 %v4062_v19, %v1736_v11  ;;  %vm1135_vm1 = vweird.f32 %v4134_v12  ;;  %v1355_v31 = vmul.f32 %v4282_v21, %v4074_v61 }
 0x188   : > { %v643_v5 = vsel %vm4292_vm12, %v642_v17, %v638_v14  ;;  %v1131_v26 = vsub.f32 1.0, %v1130_v55  ;;  %v1138_v20 = vand.u32 2147483647, %v4068_v36  ;;  %v1140_v18 = vand.u32 2147483648, %v4068_v36  ;;  %vm4346_vm3 = vmor %vm1134_vm0, %vm1135_vm1 }
 0x189   : > { %813 = vperm.xlu1 %2426, %v643_v5   ;;  %v646_v8 = vmul.f32 %v3275_v46, %v3218_v63  ;;  %v1741_v28 = vsel %vm4311_vm14, %v4062_v19, %v1737_v6  ;;  %v1370_v35 = vadd.f32 %v1354_v47, %v4103_v22  ;;  %vm650_vm2 = vweird.f32 %v3218_v63 }
 0x18a   : > { %v1132_v24 = vmul.f32 %v4134_v12, %v1131_v26  ;;  %v1746_v61 = vsel %vm4315_vm15, %v1745_v15, %v1741_v28  ;;  %v1141_v60 = vor.u32 1.1754944e-38, %v1140_v18  ;;  %vm651_vm4 = vweird.f32 %v3275_v46  ;;  %v1273_v58 = vpop.permute.xlu0 %1272  ;;  %v789_v10 = vpop.permute.xlu1 %788 }
 0x18b   : > { %v647_v23 = vsub.f32 1.0, %v646_v8  ;;  %1826 = vperm.xlu2 %2425, %v1746_v61   ;;  %vm1139_vm5 = vcmp.eq.f32.partialorder %v1138_v20, 8.507059e+37  ;;  %v656_v22 = vand.u32 2147483648, %v3218_v63  ;;  %v1838_v3 = vmul.f32 %v4334_v7, %v4165_v38  ;;  %vm652_vm8 = vmor %vm650_vm2, %vm651_vm4  ;;  %v2631_v8 = vld [vmem:[%s3057_s17 + $0x48] sm:$0xff]  ;;  %v2632_v61 = vld [vmem:[%s3057_s17] sm:$0xff] }
 0x18c   : > { %v1133_v19 = vadd.f32 %v4134_v12, %v1132_v24  ;;  %v654_v36 = vand.u32 2147483647, %v3218_v63  ;;  %v1599_v50 = vmul.f32 %v4297_v37, %v4214_v30  ;;  %vm1603_vm6 = vweird.f32 %v4214_v30 }
 0x18d   : > { %v648_v62 = vmul.f32 %v3275_v46, %v647_v23  ;;  %v1854_v0 = vadd.f32 %v1838_v3, %v1370_v35  ;;  %vm1604_vm7 = vweird.f32 %v4297_v37  ;;  %v1607_v51 = vand.u32 2147483647, %v4214_v30 }
 0x18e   : > { %v1137_v59 = vsel %vm4346_vm3, %v4134_v12, %v1133_v19  ;;  %v1600_v32 = vsub.f32 1.0, %v1599_v50  ;;  %v1609_v53 = vand.u32 2147483648, %v4214_v30  ;;  %v1839_v42 = vmul.f32 %v4334_v7, %v4141_v54  ;;  %vm4383_vm10 = vmor %vm1603_vm6, %vm1604_vm7 }
 0x18f   : > { %v1142_v38 = vsel %vm1139_vm5, %v1141_v60, %v1137_v59  ;;  %v649_v48 = vadd.f32 %v3275_v46, %v648_v62  ;;  %v657_v12 = vor.u32 1.1754944e-38, %v656_v22  ;;  %v1870_v25 = vmul.f32 %v2630_v44, %v1854_v0  ;;  %v2634_v0 = vld [vmem:[%s3057_s17 + $0x8] sm:$0xff] }
 0x190   : > { %1302 = vperm.xlu0 %2422, %v1142_v38   ;;  %v1614_v33 = vmul.f32 %v4240_v4, %v4136_v57  ;;  %vm655_vm9 = vcmp.eq.f32.partialorder %v654_v36, 8.507059e+37  ;;  %v1601_v45 = vmul.f32 %v4297_v37, %v1600_v32  ;;  %v1371_v54 = vadd.f32 %v1355_v31, %v4252_v29  ;;  %v2633_v36 = vld [vmem:[%s3057_s17 + $0x50] sm:$0xff] }
 0x191   : > { %v653_v16 = vsel %vm652_vm8, %v3275_v46, %v649_v48  ;;  %v1610_v17 = vor.u32 1.1754944e-38, %v1609_v53  ;;  %1938 = vmatmul.f32.vlgmr.msra.gmra.mxu2 %v1870_v25  ;;  %vm1608_vm11 = vcmp.eq.f32.partialorder %v1607_v51, 8.507059e+37  ;;  %v1346_v47 = vmul.f32 %v4282_v21, %v4246_v2 }
 0x192   : > { %v658_v34 = vsel %vm655_vm9, %v657_v12, %v653_v16  ;;  %v1615_v11 = vsub.f32 1.0, %v1614_v33  ;;  %v1602_v46 = vadd.f32 %v4297_v37, %v1601_v45  ;;  %v862_v29 = vmul.f32 %v4070_v40, %v4248_v9  ;;  %v2635_v12 = vld [vmem:[%s3057_s17 + $0x58] sm:$0xff] }
 0x193   : > { %818 = vperm.xlu1 %2426, %v658_v34   ;;  %v1855_v55 = vadd.f32 %v1839_v42, %v1371_v54  ;;  %v1830_v30 = vmul.f32 %v4334_v7, %v4219_v39  ;;  %vm1618_vm12 = vweird.f32 %v4136_v57  ;;  %vm1619_vm13 = vweird.f32 %v4240_v4 }
 0x194   : > { %v1616_v14 = vmul.f32 %v4240_v4, %v1615_v11  ;;  %v1606_v13 = vsel %vm4383_vm10, %v4297_v37, %v1602_v46  ;;  %v1362_v56 = vadd.f32 %v1346_v47, %v862_v29  ;;  %v1356_v2 = vmul.f32 %v4282_v21, %v4320_v43  ;;  %vm4413_vm14 = vmor %vm1618_vm12, %vm1619_vm13  ;;  %v2637_v29 = vld [vmem:[%s3057_s17 + $0x60] sm:$0xff] }
 0x195   : > { %v1611_v9 = vsel %vm1608_vm11, %v1610_v17, %v1606_v13  ;;  %v1622_v15 = vand.u32 2147483647, %v4136_v57  ;;  %v1624_v39 = vand.u32 2147483648, %v4136_v57  ;;  %v872_v5 = vmul.f32 %v4070_v40, %v4322_v49  ;;  %v1807_v57 = vpop.permute.xlu2 %1806 }
 0x196   : > { %1781 = vperm.xlu2 %2425, %v1611_v9   ;;  %v1617_v6 = vadd.f32 %v4240_v4, %v1616_v14  ;;  %v1846_v37 = vadd.f32 %v1830_v30, %v1362_v56  ;;  %v1347_v26 = vmul.f32 %v4282_v21, %v1273_v58  ;;  %v863_v31 = vmul.f32 %v4070_v40, %v789_v10  ;;  %v1323_v20 = vpop.permute.xlu0 %1322  ;;  %v2636_v10 = vld [vmem:[%s3057_s17 + $0x10] sm:$0xff] }
 0x197   : > { %v1840_v43 = vmul.f32 %v4334_v7, %v4304_v52  ;;  %v1871_v49 = vmul.f32 %v2631_v8, %v1855_v55  ;;  %v1372_v28 = vadd.f32 %v1356_v2, %v872_v5  ;;  %v839_v35 = vpop.permute.xlu1 %838  ;;  %v1831_v24 = vmul.f32 %v4334_v7, %v1757_v1  ;;  %v2638_v5 = vld [vmem:[%s3057_s17 + $0x18] sm:$0xff] }
 0x198   : > { %2427 = vset.pattern.permute.xlu0 %v2880_v27  ;;  %v1862_v41 = vmul.f32 %v2632_v61, %v1846_v37  ;;  %v1363_v60 = vadd.f32 %v1347_v26, %v863_v31  ;;  %v1625_v52 = vor.u32 1.1754944e-38, %v1624_v39  ;;  %v1357_v19 = vmul.f32 %v4282_v21, %v1323_v20 }
 0x199   : > { %1941 = vmatmul.f32.gmra.mxu2 %v1871_v49  ;;  %v1856_v23 = vadd.f32 %v1840_v43, %v1372_v28  ;;  %v873_v22 = vmul.f32 %v4070_v40, %v839_v35  ;;  %v1621_v3 = vsel %vm4413_vm14, %v4240_v4, %v1617_v6  ;;  %vm1623_vm15 = vcmp.eq.f32.partialorder %v1622_v15, 8.507059e+37  ;;  %v2639_v35 = vld [vmem:[%s3057_s17 + $0x68] sm:$0xff] }
 0x19a   : > { %1914 = vmatmul.f32.vlgmr.msra.gmra.mxu0 %v1862_v41  ;;  %v1847_v27 = vadd.f32 %v1831_v24, %v1363_v60  ;;  %v1626_v62 = vsel %vm1623_vm15, %v1625_v52, %v1621_v3  ;;  %v1841_v38 = vmul.f32 %v4334_v7, %v1807_v57  ;;  %v2640_v3 = vld [vmem:[%s3057_s17 + $0x20] sm:$0xff] }
 0x19b   : > { %v1872_v50 = vmul.f32 %v2633_v36, %v1856_v23  ;;  %v1373_v59 = vadd.f32 %v1357_v19, %v873_v22 }
 0x19c   : > { %v1863_v51 = vmul.f32 %v2634_v0, %v1847_v27  ;;  %v1994_v0 = vld [vmem:[#allocation10 + $0x78] sm:$0xff] }
 0x19d   : > { %v1857_v32 = vadd.f32 %v1841_v38, %v1373_v59  ;;  %v1762_v53 = vpop.permute.xlu2 %1761  ;;  %2311 = vmatpush.msra.mxu3 %v1994_v0  ;;  %1999 = vmatpush.msra.mxu1 %v1994_v0  ;;  %v2435_v0 = vld [vmem:[%s4553_s5] ss:$0 sm:$0xff] }
 0x19e   : > { %1786 = vperm.xlu2 %2425, %v1626_v62   ;;  %v1832_v25 = vmul.f32 %v4334_v7, %v1762_v53 }
 0x19f   : > { %v1873_v44 = vmul.f32 %v2635_v12, %v1857_v32 }
 0x1a1   : > { %1944 = vmatmul.f32.gmra.mxu2 %v1872_v50 }
 0x1a2   : > { %v1278_v48 = vpop.permute.xlu0 %1277  ;;  %1917 = vmatmul.f32.gmra.mxu0 %v1863_v51 }
 0x1a3   : > { %v1348_v4 = vmul.f32 %v4282_v21, %v1278_v48 }
 0x1a4   : > { %v794_v58 = vpop.permute.xlu1 %793 }
 0x1a5   : > { %v864_v42 = vmul.f32 %v4070_v40, %v794_v58 }
 0x1a7   : > { %v1364_v33 = vadd.f32 %v1348_v4, %v864_v42  ;;  %v1812_v34 = vpop.permute.xlu2 %1811  ;;  %v2641_v4 = vld [vmem:[%s3057_s17 + $0x70] sm:$0xff] }
 0x1a8   : > { %v1842_v11 = vmul.f32 %v4334_v7, %v1812_v34 }
 0x1a9   : > { %v1848_v1 = vadd.f32 %v1832_v25, %v1364_v33  ;;  %1947 = vmatmul.f32.gmra.mxu2 %v1873_v44  ;;  %v1993_v44 = vld [vmem:[#allocation10 + $0x70] sm:$0xff]  ;;  %v1992_v25 = vld [vmem:[#allocation10 + $0x68] sm:$0xff] }
 0x1aa   : > { %2312 = vmatpush.msra.mxu3 %v1993_v44  ;;  %2000 = vmatpush.msra.mxu1 %v1993_v44 }
 0x1ab   : > { %v1864_v16 = vmul.f32 %v2636_v10, %v1848_v1  ;;  %v1991_v1 = vld [vmem:[#allocation10 + $0x60] sm:$0xff] }
 0x1ac   : > { %2313 = vmatpush.msra.mxu3 %v1992_v25  ;;  %2001 = vmatpush.msra.mxu1 %v1992_v25 }
 0x1ad   : > { %v1328_v45 = vpop.permute.xlu0 %1327  ;;  %1920 = vmatmul.f32.gmra.mxu0 %v1864_v16 }
 0x1ae   : > { %v1358_v54 = vmul.f32 %v4282_v21, %v1328_v45  ;;  %v1990_v45 = vld [vmem:[#allocation10 + $0x58] sm:$0xff]  ;;  %2314 = vmatpush.msra.mxu3 %v1991_v1  ;;  %2002 = vmatpush.msra.mxu1 %v1991_v1 }
 0x1b0   : > { %v844_v63 = vpop.permute.xlu1 %843  ;;  %2315 = vmatpush.msra.mxu3 %v1990_v45  ;;  %2003 = vmatpush.msra.mxu1 %v1990_v45 }
 0x1b1   : > { %v874_v17 = vmul.f32 %v4070_v40, %v844_v63  ;;  %v1989_v63 = vld [vmem:[#allocation10 + $0x50] sm:$0xff] }
 0x1b2   : > { %2316 = vmatpush.msra.mxu3 %v1989_v63  ;;  %2004 = vmatpush.msra.mxu1 %v1989_v63 }
 0x1b3   : > { %v1374_v46 = vadd.f32 %v1358_v54, %v874_v17  ;;  %v1767_v13 = vpop.permute.xlu2 %1766  ;;  %v2642_v17 = vld [vmem:[%s3057_s17 + $0x28] sm:$0xff] }
 0x1b4   : > { %v1833_v9 = vmul.f32 %v4334_v7, %v1767_v13  ;;  %v1986_v13 = vld [vmem:[#allocation10 + $0x38] sm:$0xff] }
 0x1b5   : > { %v1858_v47 = vadd.f32 %v1842_v11, %v1374_v46  ;;  %v1988_v46 = vld [vmem:[#allocation10 + $0x48] sm:$0xff] }
 0x1b6   : > { %2317 = vmatpush.msra.mxu3 %v1988_v46  ;;  %2005 = vmatpush.msra.mxu1 %v1988_v46 }
 0x1b7   : > { %v1874_v55 = vmul.f32 %v2637_v29, %v1858_v47 }
 0x1b9   : > { %v1283_v30 = vpop.permute.xlu0 %1282  ;;  %1950 = vmatmul.f32.gmra.mxu2 %v1874_v55 }
 0x1ba   : > { %v1349_v14 = vmul.f32 %v4282_v21, %v1283_v30  ;;  %v1987_v30 = vld [vmem:[#allocation10 + $0x40] sm:$0xff] }
 0x1bb   : > { %2318 = vmatpush.msra.mxu3 %v1987_v30  ;;  %2006 = vmatpush.msra.mxu1 %v1987_v30 }
 0x1bc   : > { %v799_v56 = vpop.permute.xlu1 %798 }
 0x1bd   : > { %v865_v2 = vmul.f32 %v4070_v40, %v799_v56  ;;  %2319 = vmatpush.msra.mxu3 %v1986_v13  ;;  %2007 = vmatpush.msra.mxu1 %v1986_v13 }
 0x1be   : > { %v1817_v31 = vpop.permute.xlu2 %1816 }
 0x1bf   : > { %v1365_v15 = vadd.f32 %v1349_v14, %v865_v2  ;;  %v1843_v18 = vmul.f32 %v4334_v7, %v1817_v31  ;;  %v1983_v31 = vld [vmem:[#allocation10 + $0x20] sm:$0xff] }
 0x1c1   : > { %v1849_v39 = vadd.f32 %v1833_v9, %v1365_v15  ;;  %v1985_v9 = vld [vmem:[#allocation10 + $0x30] sm:$0xff] }
 0x1c2   : > { %2320 = vmatpush.msra.mxu3 %v1985_v9  ;;  %2008 = vmatpush.msra.mxu1 %v1985_v9 }
 0x1c3   : > { %v1865_v6 = vmul.f32 %v2638_v5, %v1849_v39  ;;  %v1984_v5 = vld [vmem:[#allocation10 + $0x28] sm:$0xff] }
 0x1c4   : > { %2321 = vmatpush.msra.mxu3 %v1984_v5  ;;  %2009 = vmatpush.msra.mxu1 %v1984_v5 }
 0x1c5   : > { %1923 = vmatmul.f32.gmra.mxu0 %v1865_v6  ;;  %v2643_v6 = vld [vmem:[%s3057_s17 + $0x78] sm:$0xff] }
 0x1c6   : > { %v1333_v37 = vpop.permute.xlu0 %1332  ;;  %2322 = vmatpush.msra.mxu3 %v1983_v31  ;;  %2010 = vmatpush.msra.mxu1 %v1983_v31 }
 0x1c7   : > { %v1359_v26 = vmul.f32 %v4282_v21, %v1333_v37 }
 0x1c8   : > { %v1772_v41 = vpop.permute.xlu2 %1771 }
 0x1c9   : > { %v849_v20 = vpop.permute.xlu1 %848  ;;  %v1834_v57 = vmul.f32 %v4334_v7, %v1772_v41 }
 0x1ca   : > { %v875_v43 = vmul.f32 %v4070_v40, %v849_v20 }
 0x1cc   : > { %v1375_v8 = vadd.f32 %v1359_v26, %v875_v43 }
 0x1ce   : > { %v1859_v49 = vadd.f32 %v1843_v18, %v1375_v8  ;;  %v1288_v28 = vpop.permute.xlu0 %1287  ;;  %v1982_v8 = vld [vmem:[#allocation10 + $0x18] sm:$0xff] }
 0x1cf   : > { %v1350_v61 = vmul.f32 %v4282_v21, %v1288_v28  ;;  %2323 = vmatpush.msra.mxu3 %v1982_v8  ;;  %2011 = vmatpush.msra.mxu1 %v1982_v8 }
 0x1d0   : > { %v1875_v24 = vmul.f32 %v2639_v35, %v1859_v49  ;;  %v1981_v35 = vld [vmem:[#allocation10 + $0x10] sm:$0xff] }
 0x1d1   : > { %2324 = vmatpush.msra.mxu3 %v1981_v35  ;;  %2012 = vmatpush.msra.mxu1 %v1981_v35 }
 0x1d2   : > { %1953 = vmatmul.f32.gmra.mxu2 %v1875_v24 }
 0x1d3   : > { %v804_v60 = vpop.permute.xlu1 %803  ;;  %v1822_v36 = vpop.permute.xlu2 %1821 }
 0x1d4   : > { %v866_v52 = vmul.f32 %v4070_v40, %v804_v60  ;;  %v1844_v51 = vmul.f32 %v4334_v7, %v1822_v36  ;;  %v2644_v60 = vld [vmem:[%s3057_s17 + $0x30] sm:$0xff] }
 0x1d6   : > { %v1366_v23 = vadd.f32 %v1350_v61, %v866_v52  ;;  %v1980_v61 = vld [vmem:[#allocation10 + $0x8] sm:$0xff] }
 0x1d7   : > { %2325 = vmatpush.msra.mxu3 %v1980_v61  ;;  %2013 = vmatpush.msra.mxu1 %v1980_v61 }
 0x1d8   : > { %v1850_v19 = vadd.f32 %v1834_v57, %v1366_v23  ;;  %v1979_v57 = vld [vmem:[#allocation10] sm:$0xff] }
 0x1d9   : > { %2326 = vmatpush.msra.mxu3 %v1979_v57  ;;  %2014 = vmatpush.msra.mxu1 %v1979_v57 }
 0x1da   : > { %v1338_v22 = vpop.permute.xlu0 %1337  ;;  %v1866_v27 = vmul.f32 %v2640_v3, %v1850_v19 }
 0x1db   : > { %v1360_v62 = vmul.f32 %v4282_v21, %v1338_v22 }
 0x1dc   : > { %1926 = vmatmul.f32.gmra.mxu0 %v1866_v27  ;;  %v1777_v58 = vpop.permute.xlu2 %1776 }
 0x1dd   : > { %v854_v50 = vpop.permute.xlu1 %853  ;;  %v1835_v10 = vmul.f32 %v4334_v7, %v1777_v58 }
 0x1de   : > { %v876_v59 = vmul.f32 %v4070_v40, %v854_v50  ;;  %v2645_v50 = vld [vmem:[%s3057_s17 + $0x38] sm:$0xff]  ;;  %s2109_s17 = sshll.u32 %s4482_s21, 4  ;;  %s2110_s17 = int_to_ptr.vmem [resolvable:$true] %s2109_s17 }
 0x1e0   : > { %v1376_v38 = vadd.f32 %v1360_v62, %v876_v59 }
 0x1e2   : > { %v1860_v48 = vadd.f32 %v1844_v51, %v1376_v38 }
 0x1e4   : > { %v1293_v32 = vpop.permute.xlu0 %1292  ;;  %v1876_v53 = vmul.f32 %v2641_v4, %v1860_v48 }
 0x1e5   : > { %v1351_v42 = vmul.f32 %v4282_v21, %v1293_v32  ;;  %v1827_v47 = vpop.permute.xlu2 %1826 }
 0x1e6   : > { %1956 = vmatmul.f32.gmra.mxu2 %v1876_v53  ;;  %v1845_v56 = vmul.f32 %v4334_v7, %v1827_v47 }
 0x1e7   : > { %v809_v12 = vpop.permute.xlu1 %808 }
 0x1e8   : > { %v867_v33 = vmul.f32 %v4070_v40, %v809_v12 }
 0x1ea   : > { %v1367_v16 = vadd.f32 %v1351_v42, %v867_v33 }
 0x1ec   : > { %v1851_v54 = vadd.f32 %v1835_v10, %v1367_v16 }
 0x1ee   : > { %v1343_v34 = vpop.permute.xlu0 %1342  ;;  %v1867_v11 = vmul.f32 %v2642_v17, %v1851_v54 }
 0x1ef   : > { %v1361_v29 = vmul.f32 %v4282_v21, %v1343_v34 }
 0x1f0   : > { %1929 = vmatmul.f32.gmra.mxu0 %v1867_v11  ;;  %v1782_v20 = vpop.permute.xlu2 %1781 }
 0x1f1   : > { %v859_v55 = vpop.permute.xlu1 %858  ;;  %v1836_v49 = vmul.f32 %v4334_v7, %v1782_v20 }
 0x1f2   : > { %v877_v14 = vmul.f32 %v4070_v40, %v859_v55 }
 0x1f4   : > { %v1377_v2 = vadd.f32 %v1361_v29, %v877_v14 }
 0x1f6   : > { %v1861_v15 = vadd.f32 %v1845_v56, %v1377_v2 }
 0x1f8   : > { %v1298_v39 = vpop.permute.xlu0 %1297  ;;  %v1877_v37 = vmul.f32 %v2643_v6, %v1861_v15  ;;  %v1787_v19 = vpop.permute.xlu2 %1786 }
 0x1f9   : > { %v1352_v26 = vmul.f32 %v4282_v21, %v1298_v39  ;;  %v1837_v27 = vmul.f32 %v4334_v7, %v1787_v19 }
 0x1fa   : > { %1959 = vmatmul.f32.gmra.mxu2 %v1877_v37 }
 0x1fb   : > { %v814_v43 = vpop.permute.xlu1 %813 }
 0x1fc   : > { %v868_v18 = vmul.f32 %v4070_v40, %v814_v43 }
 0x1fe   : > { %v1368_v28 = vadd.f32 %v1352_v26, %v868_v18 }
 0x200   : > { %v1852_v24 = vadd.f32 %v1836_v49, %v1368_v28 }
 0x202   : > { %v1303_v41 = vpop.permute.xlu0 %1302  ;;  %v1868_v52 = vmul.f32 %v2644_v60, %v1852_v24  ;;  %v4476_v24 = vld [vmem:[%s4555_s7] ss:$0 sm:$0xff] }
 0x203   : > { %v1353_v23 = vmul.f32 %v4282_v21, %v1303_v41 }
 0x204   : > { %1932 = vmatmul.f32.gmra.mxu0 %v1868_v52 }
 0x205   : > { %v819_v22 = vpop.permute.xlu1 %818 }
 0x206   : > { %v869_v3 = vmul.f32 %v4070_v40, %v819_v22 }
 0x208   : > { %v1369_v62 = vadd.f32 %v1353_v23, %v869_v3 }
 0x20a   : > { %v1853_v36 = vadd.f32 %v1837_v27, %v1369_v62 }
 0x20c   : > { %v1869_v59 = vmul.f32 %v2645_v50, %v1853_v36 }
 0x20e   : > { %1935 = vmatmul.f32.gmra.mxu0 %v1869_v59 }
 0x214   : > { %v1939_v21 = vpop.f32.mrf.mxu2 }
 0x215   : > { %v1940_v51 = vadd.f32 %v2435_v0, %v1939_v21 }
 0x217   : > { %v1971_v38 = vmax.f32 %v1940_v51, 0.0  ;;  %v1915_v48 = vpop.f32.mrf.mxu0 }
 0x218   : > { %v1916_v32 = vadd.f32 %v2435_v0, %v1915_v48 }
 0x219   : > { %2039 = vmatmul.f32.vlgmr.msra.gmra.mxu3 %v1971_v38 }
 0x21a   : > { %v1963_v4 = vmax.f32 %v1916_v32, 0.0 }
 0x21c   : > { %v1942_v40 = vpop.f32.mrf.mxu2  ;;  %2015 = vmatmul.f32.vlgmr.msra.gmra.mxu1 %v1963_v4 }
 0x21d   : > { %v1943_v53 = vadd.f32 %v2435_v0, %v1942_v40 }
 0x21f   : > { %v1972_v7 = vmax.f32 %v1943_v53, 0.0  ;;  %v1918_v58 = vpop.f32.mrf.mxu0 }
 0x220   : > { %v1919_v42 = vadd.f32 %v2435_v0, %v1918_v58 }
 0x221   : > { %2042 = vmatmul.f32.gmra.mxu3 %v1972_v7 }
 0x222   : > { %v1964_v12 = vmax.f32 %v1919_v42, 0.0 }
 0x224   : > { %v1945_v44 = vpop.f32.mrf.mxu2  ;;  %2018 = vmatmul.f32.gmra.mxu1 %v1964_v12 }
 0x225   : > { %v1946_v25 = vadd.f32 %v2435_v0, %v1945_v44 }
 0x227   : > { %v1973_v33 = vmax.f32 %v1946_v25, 0.0 }
 0x229   : > { %2045 = vmatmul.f32.gmra.mxu3 %v1973_v33 }
 0x22a   : > { %v1921_v1 = vpop.f32.mrf.mxu0 }
 0x22b   : > { %v1922_v10 = vadd.f32 %v2435_v0, %v1921_v1 }
 0x22c   : > { %v1948_v16 = vpop.f32.mrf.mxu2 }
 0x22d   : > { %v1965_v45 = vmax.f32 %v1922_v10, 0.0  ;;  %v1949_v54 = vadd.f32 %v2435_v0, %v1948_v16 }
 0x22f   : > { %2021 = vmatmul.f32.gmra.mxu1 %v1965_v45  ;;  %v1974_v34 = vmax.f32 %v1949_v54, 0.0 }
 0x231   : > { %2048 = vmatmul.f32.gmra.mxu3 %v1974_v34 }
 0x23c   : > { %v1951_v63 = vpop.f32.mrf.mxu2 }
 0x23d   : > { %v1952_v17 = vadd.f32 %v2435_v0, %v1951_v63 }
 0x23f   : > { %v1975_v11 = vmax.f32 %v1952_v17, 0.0 }
 0x241   : > { %2051 = vmatmul.f32.gmra.mxu3 %v1975_v11 }
 0x242   : > { %v1924_v46 = vpop.f32.mrf.mxu0 }
 0x243   : > { %v1925_v47 = vadd.f32 %v2435_v0, %v1924_v46 }
 0x245   : > { %v1966_v29 = vmax.f32 %v1925_v47, 0.0 }
 0x247   : > { %2024 = vmatmul.f32.gmra.mxu1 %v1966_v29 }
 0x255   : > { %v1954_v55 = vpop.f32.mrf.mxu2 }
 0x256   : > { %v1955_v30 = vadd.f32 %v2435_v0, %v1954_v55 }
 0x258   : > { %v1976_v14 = vmax.f32 %v1955_v30, 0.0 }
 0x259   : > { %v1927_v13 = vpop.f32.mrf.mxu0 }
 0x25a   : > { %v1928_v56 = vadd.f32 %v2435_v0, %v1927_v13  ;;  %2054 = vmatmul.f32.gmra.mxu3 %v1976_v14 }
 0x25c   : > { %v1967_v2 = vmax.f32 %v1928_v56, 0.0 }
 0x25e   : > { %2027 = vmatmul.f32.gmra.mxu1 %v1967_v2 }
 0x269   : > { %v1957_v9 = vpop.f32.mrf.mxu2 }
 0x26a   : > { %v1958_v15 = vadd.f32 %v2435_v0, %v1957_v9 }
 0x26c   : > { %v1977_v39 = vmax.f32 %v1958_v15, 0.0 }
 0x26d   : > { %v1930_v5 = vpop.f32.mrf.mxu0 }
 0x26e   : > { %2057 = vmatmul.f32.gmra.mxu3 %v1977_v39  ;;  %v1931_v6 = vadd.f32 %v2435_v0, %v1930_v5 }
 0x270   : > { %v1968_v37 = vmax.f32 %v1931_v6, 0.0 }
 0x272   : > { %2030 = vmatmul.f32.gmra.mxu1 %v1968_v37 }
 0x27d   : > { %v1960_v26 = vpop.f32.mrf.mxu2 }
 0x27e   : > { %v1961_v31 = vadd.f32 %v2435_v0, %v1960_v26 }
 0x280   : > { %v1978_v20 = vmax.f32 %v1961_v31, 0.0 }
 0x281   : > { %v1933_v43 = vpop.f32.mrf.mxu0 }
 0x282   : > { %v1934_v18 = vadd.f32 %v2435_v0, %v1933_v43  ;;  %2060 = vmatmul.f32.gmra.mxu3 %v1978_v20 }
 0x284   : > { %v1969_v8 = vmax.f32 %v1934_v18, 0.0 }
 0x286   : > { %2033 = vmatmul.f32.gmra.mxu1 %v1969_v8 }
 0x28b   : > { %v1936_v49 = vpop.f32.mrf.mxu0 }
 0x28c   : > { %v1937_v28 = vadd.f32 %v2435_v0, %v1936_v49 }
 0x28e   : > { %v1970_v35 = vmax.f32 %v1937_v28, 0.0 }
 0x290   : > { %2036 = vmatmul.f32.gmra.mxu1 %v1970_v35 }
 0x299   : > { %v2016_v61 = vpop.f32.mrf.mxu1 }
 0x29a   : > { %v2017_v41 = vadd.f32 %v4476_v24, %v2016_v61 }
 0x29c   : > { %v2064_v60 = vmax.f32 %v2017_v41, 0.0  ;;  %v2040_v52 = vpop.f32.mrf.mxu3 }
 0x29d   : > { %v2041_v57 = vadd.f32 %v4476_v24, %v2040_v52 }
 0x29e   : > { %2080 = vst [vmem:[%s4482_s21] sm:$0xff] %v2064_v60 }
 0x29f   : > { %v2072_v23 = vmax.f32 %v2041_v57, 0.0 }
 0x2a1   : > { %2088 = vst [vmem:[%s4482_s21 + $0x40] sm:$0xff] %v2072_v23  ;;  %v2019_v19 = vpop.f32.mrf.mxu1 }
 0x2a2   : > { %v2020_v22 = vadd.f32 %v4476_v24, %v2019_v19 }
 0x2a4   : > { %v2043_v3 = vpop.f32.mrf.mxu3  ;;  %v2065_v27 = vmax.f32 %v2020_v22, 0.0 }
 0x2a5   : > { %v2044_v62 = vadd.f32 %v4476_v24, %v2043_v3 }
 0x2a6   : > { %2081 = vst [vmem:[%s4482_s21 + $0x8] sm:$0xff] %v2065_v27 }
 0x2a7   : > { %v2073_v36 = vmax.f32 %v2044_v62, 0.0 }
 0x2a9   : > { %2089 = vst [vmem:[%s4482_s21 + $0x48] sm:$0xff] %v2073_v36 }
 0x2ac   : > { %v2022_v50 = vpop.f32.mrf.mxu1  ;;  %v2046_v59 = vpop.f32.mrf.mxu3 }
 0x2ad   : > { %v2023_v0 = vadd.f32 %v4476_v24, %v2022_v50  ;;  %v2047_v21 = vadd.f32 %v4476_v24, %v2046_v59 }
 0x2af   : > { %v2066_v51 = vmax.f32 %v2023_v0, 0.0  ;;  %v2074_v38 = vmax.f32 %v2047_v21, 0.0 }
 0x2b1   : > { %2082 = vst [vmem:[%s4482_s21 + $0x10] sm:$0xff] %v2066_v51 }
 0x2b2   : > { %2090 = vst [vmem:[%s4482_s21 + $0x50] sm:$0xff] %v2074_v38 }
 0x2b4   : > { %v2049_v48 = vpop.f32.mrf.mxu3 }
 0x2b5   : > { %v2050_v32 = vadd.f32 %v4476_v24, %v2049_v48 }
 0x2b7   : > { %v2075_v4 = vmax.f32 %v2050_v32, 0.0 }
 0x2b9   : > { %2091 = vst [vmem:[%s4482_s21 + $0x58] sm:$0xff] %v2075_v4 }
 0x2c4   : > { %v2025_v40 = vpop.f32.mrf.mxu1  ;;  %v2052_v53 = vpop.f32.mrf.mxu3 }
 0x2c5   : > { %v2026_v7 = vadd.f32 %v4476_v24, %v2025_v40  ;;  %v2053_v58 = vadd.f32 %v4476_v24, %v2052_v53 }
 0x2c7   : > { %v2067_v42 = vmax.f32 %v2026_v7, 0.0  ;;  %v2076_v12 = vmax.f32 %v2053_v58, 0.0 }
 0x2c9   : > { %2083 = vst [vmem:[%s4482_s21 + $0x18] sm:$0xff] %v2067_v42 }
 0x2ca   : > { %2092 = vst [vmem:[%s4482_s21 + $0x60] sm:$0xff] %v2076_v12 }
 0x2db   : > { %v2028_v44 = vpop.f32.mrf.mxu1 }
 0x2dc   : > { %v2029_v25 = vadd.f32 %v4476_v24, %v2028_v44 }
 0x2dd   : > { %v2055_v33 = vpop.f32.mrf.mxu3 }
 0x2de   : > { %v2068_v1 = vmax.f32 %v2029_v25, 0.0  ;;  %v2056_v10 = vadd.f32 %v4476_v24, %v2055_v33 }
 0x2e0   : > { %2084 = vst [vmem:[%s4482_s21 + $0x20] sm:$0xff] %v2068_v1  ;;  %v2077_v16 = vmax.f32 %v2056_v10, 0.0 }
 0x2e2   : > { %2093 = vst [vmem:[%s4482_s21 + $0x68] sm:$0xff] %v2077_v16 }
 0x2ef   : > { %v2031_v45 = vpop.f32.mrf.mxu1 }
 0x2f0   : > { %v2032_v54 = vadd.f32 %v4476_v24, %v2031_v45 }
 0x2f1   : > { %v2058_v34 = vpop.f32.mrf.mxu3 }
 0x2f2   : > { %v2059_v63 = vadd.f32 %v4476_v24, %v2058_v34  ;;  %v2069_v17 = vmax.f32 %v2032_v54, 0.0 }
 0x2f4   : > { %v2078_v11 = vmax.f32 %v2059_v63, 0.0  ;;  %2085 = vst [vmem:[%s4482_s21 + $0x28] sm:$0xff] %v2069_v17 }
 0x2f6   : > { %2094 = vst [vmem:[%s4482_s21 + $0x70] sm:$0xff] %v2078_v11 }
 0x303   : > { %v2034_v46 = vpop.f32.mrf.mxu1 }
 0x304   : > { %v2035_v47 = vadd.f32 %v4476_v24, %v2034_v46 }
 0x305   : > { %v2061_v55 = vpop.f32.mrf.mxu3 }
 0x306   : > { %v2070_v29 = vmax.f32 %v2035_v47, 0.0  ;;  %v2062_v30 = vadd.f32 %v4476_v24, %v2061_v55 }
 0x308   : > { %2086 = vst [vmem:[%s4482_s21 + $0x30] sm:$0xff] %v2070_v29  ;;  %v2079_v14 = vmax.f32 %v2062_v30, 0.0 }
 0x30a   : > { %2095 = vst [vmem:[%s4482_s21 + $0x78] sm:$0xff] %v2079_v14 }
 0x30d   : > { %v2037_v13 = vpop.f32.mrf.mxu1 }
 0x30e   : > { %v2038_v56 = vadd.f32 %v4476_v24, %v2037_v13 }
 0x310   : > { %v2071_v2 = vmax.f32 %v2038_v56, 0.0 }
 0x312   : > { %2087 = vst [vmem:[%s4482_s21 + $0x38] sm:$0xff] %v2071_v2 }
 0x313   : > { %2823 = shalt.err (!%p2820_p11)
}
 0x314   : > { %s2881_s18 = smov 128   ;;  %s2882_s21 = smov 8  }
 0x315   : > { %2345 = dma.vmem_to_hbm [thread:$0]  (%p3018_p3), %s2110_s17, 2048, %s2112_s11, %s2097_s9, %s2881_s18, %s2881_s18, %s2882_s21  }
 0x316 PF: > { %s2126_s22 = sand.u32 1, %s2858_s27   ;;  %p4673_p12 = scmp.ge.s32.totalorder %s2870_s30, 2 }
 0x317   : > { %s2127_s23 = scalar_lea.sflag [#allocation4], %s2126_s22 }
 0x318   : > { %p2365_p13 = pnand %p4673_p12, %p2963_p6 }
 0x31a   : > { %p2366_p0 = pneg %p2365_p13 }
 0x31c   : > { %2853 = dma.done.wait (%p2366_p0), %s2127_s23, 2048  }
 0x31d   : > { %2855 = vsyncadd (%p2366_p0), %s2127_s23, 4294965248  ;;  %p23_p5 = scmp.ge.s32.totalorder %s3008_s24, 4   ;;  %s4674_s27 = smov %s2862_s28 }
 0x31e   : > { %s4675_s28 = smov %s2866_s29  ;;  %s4676_s29 = smov %s3024_s15 }
 0x31f   : > { %s4677_s30 = smov %s3008_s24  ;;  %25 = sbr.rel (!%p23_p5) target bundleno = 10 (0xa), region = 113 }
 0x324   :  { %2133 = vsyncpa [#allocation3], 1 }
 0x325   :  { %2135 = vsyncpa [#allocation3 + $0x1], 1 }
 0x326   :  { %2136 = vsyncpa [#allocation6], 1 }
 0x327   :  { %2137 = vsyncpa [#allocation9], 1 }
 0x328   :  { %2138 = vsyncpa [#allocation4], 1 }
 0x329   :  { %2140 = vsyncpa [#allocation4 + $0x1], 1 }

</bundles_post_ra>
